<compile_context>
chip_gen: v6e
topology: v6e:2x2x1
jax: 0.10.0
libtpu: 0.0.40
codegen_flags: <defaults>
</compile_context>

<pallas_src>
import functools

import jax
import jax.numpy as jnp
import numpy as np
from jax.experimental import pallas as pl
from jax.experimental.pallas import tpu as pltpu


# ----------------------------------------------------------------------------
# Kernel factory: fused ConvLSTM recurrence over a time grid.
# ----------------------------------------------------------------------------
def _make_seq_kernel(*, C, Cpad, K, pad, H, W, N):
    KKC = K * K * C  # rows of one source's patch block

    def kernel(x_ref, h0_ref, c0_ref, w_ref, b_ref, mask_ref,
               h_seq_ref, c_out_ref, h_state, c_state, pat):
        t = pl.program_id(0)

        # Load the initial hidden / cell state into resident VMEM scratch.
        @pl.when(t == 0)
        def _init():
            h_state[...] = h0_ref[...]
            c_state[...] = c0_ref[...]

        xb = x_ref[0]           # (C, N) f32, this step's input in CN layout
        hb = h_state[0:C, :]    # (C, N) f32, previous hidden state

        # In-kernel im2col: 3x3 taps for x and h via lane rotations (XLU)
        # masked at image boundaries (also kills cross-batch wrap-around).
        for ti in range(K * K):
            dr = ti // K - pad
            dc = ti % K - pad
            shift = (-(dr * W + dc)) % N        # static Python int
            m = mask_ref[C * ti:C * (ti + 1), :]            # (C, N)
            if shift == 0:
                x_tap, h_tap = xb, hb
            else:
                x_tap = pltpu.roll(xb, shift=shift, axis=1)
                h_tap = pltpu.roll(hb, shift=shift, axis=1)
            pat[C * ti:C * (ti + 1), :] = x_tap * m
            pat[KKC + C * ti:KKC + C * (ti + 1), :] = h_tap * m

        # Single fused matmul (bf16 operands, f32 accumulation) + fused bias.
        gates = jnp.dot(w_ref[...], pat[...].astype(jnp.bfloat16),
                        preferred_element_type=jnp.float32) + b_ref[...]

        # Gate blocks are padded to 8 rows -> clean full-tile slices.
        i_g = jax.nn.sigmoid(gates[0 * Cpad:1 * Cpad, :])
        f_g = jax.nn.sigmoid(gates[1 * Cpad:2 * Cpad, :])
        g_g = jnp.tanh(gates[2 * Cpad:3 * Cpad, :])
        o_g = jax.nn.sigmoid(gates[3 * Cpad:4 * Cpad, :])

        next_c = f_g * c_state[...] + i_g * g_g
        next_h = o_g * jnp.tanh(next_c)

        c_state[...] = next_c
        h_state[...] = next_h
        h_seq_ref[0, :, :] = next_h

        @pl.when(t == pl.num_programs(0) - 1)
        def _finalize():
            c_out_ref[...] = next_c

    return kernel


# ----------------------------------------------------------------------------
# Wrapper: layout conversion, weight fusion/padding, pallas_call.
# ----------------------------------------------------------------------------
def _flatten_conv_weight(w_oihw, K):
    """(O, I, kh, kw) -> (O, kh*kw*I): tap-major, cin-minor."""
    oc, ic = w_oihw.shape[0], w_oihw.shape[1]
    return w_oihw.transpose(0, 2, 3, 1).reshape(oc, K * K * ic)


@functools.partial(jax.jit, static_argnames=("ksize", "padding"))
def convlstm_seq_forward(xs, h0, c0, wx, bx, wh, bh, *, ksize=3, padding=1):
    """Fused multi-step ConvLSTM rollout.

    xs: (T, B, C, H, W); h0, c0: (B, C, H, W) NCHW.
    Returns (h_seq (T, B, C, H, W), (h_T, c_T)).
    """
    T, B, C, H, W = xs.shape
    Cout = wx.shape[0] // 4
    assert Cout == C, "reference ConvLSTM_Cell requires input_channel == output_channel"
    K = ksize
    N = B * H * W
    KKC = K * K * C
    Cpad = -(-C // 8) * 8            # pad channel blocks to full f32 sublane tiles

    # ---- CN layout: channels on sublanes, flattened (b, h, w) pixels on lanes ----
    x_cn = xs.transpose(0, 2, 1, 3, 4).reshape(T, C, N).astype(jnp.float32)
    h0_cn = jnp.pad(h0.transpose(1, 0, 2, 3).reshape(C, N), ((0, Cpad - C), (0, 0)))
    c0_cn = jnp.pad(c0.transpose(1, 0, 2, 3).reshape(C, N), ((0, Cpad - C), (0, 0)))

    # ---- fused weight: (4*Cpad, 2*K*K*C) bf16, each gate padded to 8 rows,
    #      x-tap columns followed by h-tap columns; fused bias (4*Cpad, 1) f32 ----
    wx_m = _flatten_conv_weight(wx, K).reshape(4, C, KKC)
    wh_m = _flatten_conv_weight(wh, K).reshape(4, C, KKC)
    w_cat = jnp.concatenate([wx_m, wh_m], axis=2)                   # (4, C, 2*KKC)
    w_f = jnp.pad(w_cat, ((0, 0), (0, Cpad - C), (0, 0)))
    w_f = w_f.reshape(4 * Cpad, 2 * KKC).astype(jnp.bfloat16)

    b_f = jnp.pad((bx + bh).reshape(4, C), ((0, 0), (0, Cpad - C)))
    b_f = b_f.reshape(4 * Cpad, 1).astype(jnp.float32)

    # ---- boundary masks for the in-kernel im2col (implements zero padding) ----
    pix = jnp.arange(N)
    rr = (pix // W) % H
    cc = pix % W
    mask_rows = []
    for ti in range(K * K):
        dr, dc = ti // K - padding, ti % K - padding
        m = ((rr + dr >= 0) & (rr + dr < H) & (cc + dc >= 0) & (cc + dc < W))
        mask_rows.append(jnp.broadcast_to(m.astype(jnp.float32), (C, N)))
    mask_arr = jnp.concatenate(mask_rows, axis=0)                   # (K*K*C, N)

    kernel = _make_seq_kernel(C=C, Cpad=Cpad, K=K, pad=padding, H=H, W=W, N=N)

    h_seq_cn, c_fin_cn = pl.pallas_call(
        kernel,
        out_shape=(
            jax.ShapeDtypeStruct((T, Cpad, N), jnp.float32),
            jax.ShapeDtypeStruct((Cpad, N), jnp.float32),
        ),
        grid_spec=pltpu.PrefetchScalarGridSpec(
            num_scalar_prefetch=0,
            grid=(T,),
            in_specs=[
                pl.BlockSpec((1, C, N), lambda t: (t, 0, 0)),          # x, per step
                pl.BlockSpec((Cpad, N), lambda t: (0, 0)),             # h0 (resident)
                pl.BlockSpec((Cpad, N), lambda t: (0, 0)),             # c0 (resident)
                pl.BlockSpec((4 * Cpad, 2 * KKC), lambda t: (0, 0)),   # fused weight
                pl.BlockSpec((4 * Cpad, 1), lambda t: (0, 0)),         # fused bias
                pl.BlockSpec((KKC, N), lambda t: (0, 0)),              # im2col masks
            ],
            out_specs=(
                pl.BlockSpec((1, Cpad, N), lambda t: (t, 0, 0)),       # h per step
                pl.BlockSpec((Cpad, N), lambda t: (0, 0)),             # final c
            ),
            scratch_shapes=[
                pltpu.VMEM((Cpad, N), jnp.float32),                    # h state
                pltpu.VMEM((Cpad, N), jnp.float32),                    # c state
                pltpu.VMEM((2 * KKC, N), jnp.float32),                 # fused patches
            ],
        ),
        compiler_params=pltpu.CompilerParams(
            dimension_semantics=("arbitrary",)),   # recurrent time axis
    )(x_cn, h0_cn, c0_cn, w_f, b_f, mask_arr)

    h_seq = h_seq_cn[:, :C, :].reshape(T, C, B, H, W).transpose(0, 2, 1, 3, 4)
    c_fin = c_fin_cn[:C, :].reshape(C, B, H, W).transpose(1, 0, 2, 3)
    return h_seq, (h_seq[-1], c_fin)


def convlstm_cell_forward(x, hiddens, wx, bx, wh, bh, *, ksize=3, padding=1):
    """Single-step forward with the module's semantics: (output, [next_h, next_c])."""
    B, C, H, W = x.shape
    if hiddens is None:
        h = jnp.zeros((B, C, H, W), jnp.float32)
        c = jnp.zeros((B, C, H, W), jnp.float32)
    else:
        h, c = hiddens
    h_seq, (_, c_t) = convlstm_seq_forward(x[None], h, c, wx, bx, wh, bh,
                                           ksize=ksize, padding=padding)
    out = h_seq[0]
    return out, (out, c_t)


# ----------------------------------------------------------------------------
# Pure-JAX reference (mirrors the PyTorch forward) for correctness check.
# ----------------------------------------------------------------------------
def _reference_forward(x, h, c, wx, bx, wh, bh):
    dn = ("NCHW", "OIHW", "NCHW")
    x2h = jax.lax.conv_general_dilated(x, wx, (1, 1), ((1, 1), (1, 1)),
                                       dimension_numbers=dn) + bx[None, :, None, None]
    h2h = jax.lax.conv_general_dilated(h, wh, (1, 1), ((1, 1), (1, 1)),
                                       dimension_numbers=dn) + bh[None, :, None, None]
    i, f, g, o = jnp.split(x2h + h2h, 4, axis=1)
    i = jax.nn.sigmoid(i)
    f = jax.nn.sigmoid(f)
    g = jnp.tanh(g)
    next_c = f * c + i * g
    o = jax.nn.sigmoid(o)
    next_h = o * jnp.tanh(next_c)
    return next_h, next_c


if __name__ == "__main__":
    # Module config: input_channel = output_channel = 4, b_h_w = (2, 16, 16),
    # kernel_size=3, stride=1, padding=1, sequence length 8.
    B, C, H, W = 2, 4, 16, 16
    K, T = 3, 8

    key = jax.random.PRNGKey(0)
    kxs, kwx, kwh, kbx, kbh = jax.random.split(key, 5)

    xs = jax.random.normal(kxs, (T, B, C, H, W), dtype=jnp.float32)
    h0 = jnp.zeros((B, C, H, W), dtype=jnp.float32)
    c0 = jnp.zeros((B, C, H, W), dtype=jnp.float32)

    wx = jax.random.normal(kwx, (4 * C, C, K, K), dtype=jnp.float32) * 0.1
    wh = jax.random.normal(kwh, (4 * C, C, K, K), dtype=jnp.float32) * 0.1
    bx = jax.random.normal(kbx, (4 * C,), dtype=jnp.float32) * 0.1
    bh = jax.random.normal(kbh, (4 * C,), dtype=jnp.float32) * 0.1

    # --- single-step call (hiddens=None branch of the module) ---
    out1, (h1, c1) = convlstm_cell_forward(xs[0], None, wx, bx, wh, bh)

    # --- fused multi-step rollout (one pallas_call for the whole sequence) ---
    h_seq, (hT, cT) = convlstm_seq_forward(xs, h0, c0, wx, bx, wh, bh)
    jax.block_until_ready((out1, h1, c1, h_seq, hT, cT))

    # --- correctness vs. pure-JAX reference of the PyTorch forward ---
    # bf16 MXU operands -> loosened tolerance (gate/state math stays f32).
    TOL = dict(rtol=2e-2, atol=2e-2)

    rh1, rc1 = _reference_forward(xs[0], h0, c0, wx, bx, wh, bh)
    np.testing.assert_allclose(np.asarray(out1), np.asarray(rh1), **TOL)
    np.testing.assert_allclose(np.asarray(c1), np.asarray(rc1), **TOL)

    rh, rc = h0, c0
    ref_seq = []
    for t in range(T):
        rh, rc = _reference_forward(xs[t], rh, rc, wx, bx, wh, bh)
        ref_seq.append(rh)
    ref_seq = jnp.stack(ref_seq)
    np.testing.assert_allclose(np.asarray(h_seq), np.asarray(ref_seq), **TOL)
    np.testing.assert_allclose(np.asarray(hT), np.asarray(rh), **TOL)
    np.testing.assert_allclose(np.asarray(cT), np.asarray(rc), **TOL)

    print("KERNEL_OK")
</pallas_src>

<mosaic_0001>
module attributes {stable_mosaic.version = 11 : i64} {
  func.func @kernel(%arg0: i32, %arg1: memref<1x4x512xf32, #tpu.memory_space<vmem>>, %arg2: memref<8x512xf32, #tpu.memory_space<vmem>>, %arg3: memref<8x512xf32, #tpu.memory_space<vmem>>, %arg4: memref<32x72xbf16, #tpu.memory_space<vmem>>, %arg5: memref<32x1xf32, #tpu.memory_space<vmem>>, %arg6: memref<36x512xf32, #tpu.memory_space<vmem>>, %arg7: memref<1x8x512xf32, #tpu.memory_space<vmem>>, %arg8: memref<8x512xf32, #tpu.memory_space<vmem>>, %arg9: memref<8x512xf32, #tpu.memory_space<vmem>>, %arg10: memref<8x512xf32, #tpu.memory_space<vmem>>, %arg11: memref<72x512xf32, #tpu.memory_space<vmem>>) attributes {dimension_semantics = [#tpu.dimension_semantics<arbitrary>], iteration_bounds = array<i64: 1>, scalar_prefetch = 0 : i64, scratch_operands = 3 : i64, tpu.core_type = #tpu.core_type<tc>, window_params = [{transform_indices = @transform_0, window_bounds = array<i64: 1, 4, 512>}, {pipeline_mode = #tpu.pipeline_mode<synchronous>, transform_indices = @transform_1, window_bounds = array<i64: 8, 512>}, {pipeline_mode = #tpu.pipeline_mode<synchronous>, transform_indices = @transform_2, window_bounds = array<i64: 8, 512>}, {pipeline_mode = #tpu.pipeline_mode<synchronous>, transform_indices = @transform_3, window_bounds = array<i64: 32, 72>}, {pipeline_mode = #tpu.pipeline_mode<synchronous>, transform_indices = @transform_4, window_bounds = array<i64: 32, 1>}, {pipeline_mode = #tpu.pipeline_mode<synchronous>, transform_indices = @transform_5, window_bounds = array<i64: 36, 512>}, {transform_indices = @transform_6, window_bounds = array<i64: 1, 8, 512>}, {pipeline_mode = #tpu.pipeline_mode<synchronous>, transform_indices = @transform_7, window_bounds = array<i64: 8, 512>}]} {
    %c0_i32 = arith.constant 0 : i32
    %0 = arith.cmpi eq, %arg0, %c0_i32 : i32
    %1 = arith.extui %0 : i1 to i32
    %c0_i32_0 = arith.constant 0 : i32
    %2 = arith.cmpi ne, %1, %c0_i32_0 : i32
    scf.if %2 {
      %c0_70 = arith.constant 0 : index
      %c0_71 = arith.constant 0 : index
      %108 = vector.load %arg2[%c0_70, %c0_71] : memref<8x512xf32, #tpu.memory_space<vmem>>, vector<8x512xf32>
      %c0_72 = arith.constant 0 : index
      %c0_73 = arith.constant 0 : index
      %109 = vector.load %arg9[%c0_72, %c0_73] : memref<8x512xf32, #tpu.memory_space<vmem>>, vector<8x512xf32>
      tpu.vector_store %arg9[%c0_72, %c0_73], %108 {strides = array<i32>} : memref<8x512xf32, #tpu.memory_space<vmem>>, vector<8x512xf32>,
      %c0_74 = arith.constant 0 : index
      %c0_75 = arith.constant 0 : index
      %110 = vector.load %arg3[%c0_74, %c0_75] : memref<8x512xf32, #tpu.memory_space<vmem>>, vector<8x512xf32>
      %c0_76 = arith.constant 0 : index
      %c0_77 = arith.constant 0 : index
      %111 = vector.load %arg10[%c0_76, %c0_77] : memref<8x512xf32, #tpu.memory_space<vmem>>, vector<8x512xf32>
      tpu.vector_store %arg10[%c0_76, %c0_77], %110 {strides = array<i32>} : memref<8x512xf32, #tpu.memory_space<vmem>>, vector<8x512xf32>,
    } else {
    }
    %c0 = arith.constant 0 : index
    %c0_1 = arith.constant 0 : index
    %c0_2 = arith.constant 0 : index
    %3 = vector.load %arg1[%c0, %c0_1, %c0_2] : memref<1x4x512xf32, #tpu.memory_space<vmem>>, vector<1x4x512xf32>
    %4 = vector.shape_cast %3 : vector<1x4x512xf32> to vector<4x512xf32>
    %c0_3 = arith.constant 0 : index
    %c0_4 = arith.constant 0 : index
    %5 = vector.load %arg9[%c0_3, %c0_4] : memref<8x512xf32, #tpu.memory_space<vmem>>, vector<4x512xf32>
    %c0_5 = arith.constant 0 : index
    %c0_6 = arith.constant 0 : index
    %6 = vector.load %arg6[%c0_5, %c0_6] : memref<36x512xf32, #tpu.memory_space<vmem>>, vector<4x512xf32>
    %c17_i32 = arith.constant 17 : i32
    %7 = tpu.dynamic_rotate %4 by %c17_i32 dim 1 : vector<4x512xf32>, i32 -> vector<4x512xf32>
    %c17_i32_7 = arith.constant 17 : i32
    %8 = tpu.dynamic_rotate %5 by %c17_i32_7 dim 1 : vector<4x512xf32>, i32 -> vector<4x512xf32>
    %9 = arith.mulf %7, %6 : vector<4x512xf32>
    %c0_8 = arith.constant 0 : index
    %c0_9 = arith.constant 0 : index
    %10 = vector.load %arg11[%c0_8, %c0_9] : memref<72x512xf32, #tpu.memory_space<vmem>>, vector<4x512xf32>
    tpu.vector_store %arg11[%c0_8, %c0_9], %9 {strides = array<i32>} : memref<72x512xf32, #tpu.memory_space<vmem>>, vector<4x512xf32>,
    %11 = arith.mulf %8, %6 : vector<4x512xf32>
    %c36 = arith.constant 36 : index
    %c0_10 = arith.constant 0 : index
    %12 = vector.load %arg11[%c36, %c0_10] : memref<72x512xf32, #tpu.memory_space<vmem>>, vector<4x512xf32>
    tpu.vector_store %arg11[%c36, %c0_10], %11 {strides = array<i32>} : memref<72x512xf32, #tpu.memory_space<vmem>>, vector<4x512xf32>,
    %c4 = arith.constant 4 : index
    %c0_11 = arith.constant 0 : index
    %13 = vector.load %arg6[%c4, %c0_11] : memref<36x512xf32, #tpu.memory_space<vmem>>, vector<4x512xf32>
    %c16_i32 = arith.constant 16 : i32
    %14 = tpu.dynamic_rotate %4 by %c16_i32 dim 1 : vector<4x512xf32>, i32 -> vector<4x512xf32>
    %c16_i32_12 = arith.constant 16 : i32
    %15 = tpu.dynamic_rotate %5 by %c16_i32_12 dim 1 : vector<4x512xf32>, i32 -> vector<4x512xf32>
    %16 = arith.mulf %14, %13 : vector<4x512xf32>
    %c4_13 = arith.constant 4 : index
    %c0_14 = arith.constant 0 : index
    %17 = vector.load %arg11[%c4_13, %c0_14] : memref<72x512xf32, #tpu.memory_space<vmem>>, vector<4x512xf32>
    tpu.vector_store %arg11[%c4_13, %c0_14], %16 {strides = array<i32>} : memref<72x512xf32, #tpu.memory_space<vmem>>, vector<4x512xf32>,
    %18 = arith.mulf %15, %13 : vector<4x512xf32>
    %c40 = arith.constant 40 : index
    %c0_15 = arith.constant 0 : index
    %19 = vector.load %arg11[%c40, %c0_15] : memref<72x512xf32, #tpu.memory_space<vmem>>, vector<4x512xf32>
    tpu.vector_store %arg11[%c40, %c0_15], %18 {strides = array<i32>} : memref<72x512xf32, #tpu.memory_space<vmem>>, vector<4x512xf32>,
    %c8 = arith.constant 8 : index
    %c0_16 = arith.constant 0 : index
    %20 = vector.load %arg6[%c8, %c0_16] : memref<36x512xf32, #tpu.memory_space<vmem>>, vector<4x512xf32>
    %c15_i32 = arith.constant 15 : i32
    %21 = tpu.dynamic_rotate %4 by %c15_i32 dim 1 : vector<4x512xf32>, i32 -> vector<4x512xf32>
    %c15_i32_17 = arith.constant 15 : i32
    %22 = tpu.dynamic_rotate %5 by %c15_i32_17 dim 1 : vector<4x512xf32>, i32 -> vector<4x512xf32>
    %23 = arith.mulf %21, %20 : vector<4x512xf32>
    %c8_18 = arith.constant 8 : index
    %c0_19 = arith.constant 0 : index
    %24 = vector.load %arg11[%c8_18, %c0_19] : memref<72x512xf32, #tpu.memory_space<vmem>>, vector<4x512xf32>
    tpu.vector_store %arg11[%c8_18, %c0_19], %23 {strides = array<i32>} : memref<72x512xf32, #tpu.memory_space<vmem>>, vector<4x512xf32>,
    %25 = arith.mulf %22, %20 : vector<4x512xf32>
    %c44 = arith.constant 44 : index
    %c0_20 = arith.constant 0 : index
    %26 = vector.load %arg11[%c44, %c0_20] : memref<72x512xf32, #tpu.memory_space<vmem>>, vector<4x512xf32>
    tpu.vector_store %arg11[%c44, %c0_20], %25 {strides = array<i32>} : memref<72x512xf32, #tpu.memory_space<vmem>>, vector<4x512xf32>,
    %c12 = arith.constant 12 : index
    %c0_21 = arith.constant 0 : index
    %27 = vector.load %arg6[%c12, %c0_21] : memref<36x512xf32, #tpu.memory_space<vmem>>, vector<4x512xf32>
    %c1_i32 = arith.constant 1 : i32
    %28 = tpu.dynamic_rotate %4 by %c1_i32 dim 1 : vector<4x512xf32>, i32 -> vector<4x512xf32>
    %c1_i32_22 = arith.constant 1 : i32
    %29 = tpu.dynamic_rotate %5 by %c1_i32_22 dim 1 : vector<4x512xf32>, i32 -> vector<4x512xf32>
    %30 = arith.mulf %28, %27 : vector<4x512xf32>
    %c12_23 = arith.constant 12 : index
    %c0_24 = arith.constant 0 : index
    %31 = vector.load %arg11[%c12_23, %c0_24] : memref<72x512xf32, #tpu.memory_space<vmem>>, vector<4x512xf32>
    tpu.vector_store %arg11[%c12_23, %c0_24], %30 {strides = array<i32>} : memref<72x512xf32, #tpu.memory_space<vmem>>, vector<4x512xf32>,
    %32 = arith.mulf %29, %27 : vector<4x512xf32>
    %c48 = arith.constant 48 : index
    %c0_25 = arith.constant 0 : index
    %33 = vector.load %arg11[%c48, %c0_25] : memref<72x512xf32, #tpu.memory_space<vmem>>, vector<4x512xf32>
    tpu.vector_store %arg11[%c48, %c0_25], %32 {strides = array<i32>} : memref<72x512xf32, #tpu.memory_space<vmem>>, vector<4x512xf32>,
    %c16 = arith.constant 16 : index
    %c0_26 = arith.constant 0 : index
    %34 = vector.load %arg6[%c16, %c0_26] : memref<36x512xf32, #tpu.memory_space<vmem>>, vector<4x512xf32>
    %35 = arith.mulf %4, %34 : vector<4x512xf32>
    %c16_27 = arith.constant 16 : index
    %c0_28 = arith.constant 0 : index
    %36 = vector.load %arg11[%c16_27, %c0_28] : memref<72x512xf32, #tpu.memory_space<vmem>>, vector<4x512xf32>
    tpu.vector_store %arg11[%c16_27, %c0_28], %35 {strides = array<i32>} : memref<72x512xf32, #tpu.memory_space<vmem>>, vector<4x512xf32>,
    %37 = arith.mulf %5, %34 : vector<4x512xf32>
    %c52 = arith.constant 52 : index
    %c0_29 = arith.constant 0 : index
    %38 = vector.load %arg11[%c52, %c0_29] : memref<72x512xf32, #tpu.memory_space<vmem>>, vector<4x512xf32>
    tpu.vector_store %arg11[%c52, %c0_29], %37 {strides = array<i32>} : memref<72x512xf32, #tpu.memory_space<vmem>>, vector<4x512xf32>,
    %c20 = arith.constant 20 : index
    %c0_30 = arith.constant 0 : index
    %39 = vector.load %arg6[%c20, %c0_30] : memref<36x512xf32, #tpu.memory_space<vmem>>, vector<4x512xf32>
    %c511_i32 = arith.constant 511 : i32
    %40 = tpu.dynamic_rotate %4 by %c511_i32 dim 1 : vector<4x512xf32>, i32 -> vector<4x512xf32>
    %c511_i32_31 = arith.constant 511 : i32
    %41 = tpu.dynamic_rotate %5 by %c511_i32_31 dim 1 : vector<4x512xf32>, i32 -> vector<4x512xf32>
    %42 = arith.mulf %40, %39 : vector<4x512xf32>
    %c20_32 = arith.constant 20 : index
    %c0_33 = arith.constant 0 : index
    %43 = vector.load %arg11[%c20_32, %c0_33] : memref<72x512xf32, #tpu.memory_space<vmem>>, vector<4x512xf32>
    tpu.vector_store %arg11[%c20_32, %c0_33], %42 {strides = array<i32>} : memref<72x512xf32, #tpu.memory_space<vmem>>, vector<4x512xf32>,
    %44 = arith.mulf %41, %39 : vector<4x512xf32>
    %c56 = arith.constant 56 : index
    %c0_34 = arith.constant 0 : index
    %45 = vector.load %arg11[%c56, %c0_34] : memref<72x512xf32, #tpu.memory_space<vmem>>, vector<4x512xf32>
    tpu.vector_store %arg11[%c56, %c0_34], %44 {strides = array<i32>} : memref<72x512xf32, #tpu.memory_space<vmem>>, vector<4x512xf32>,
    %c24 = arith.constant 24 : index
    %c0_35 = arith.constant 0 : index
    %46 = vector.load %arg6[%c24, %c0_35] : memref<36x512xf32, #tpu.memory_space<vmem>>, vector<4x512xf32>
    %c497_i32 = arith.constant 497 : i32
    %47 = tpu.dynamic_rotate %4 by %c497_i32 dim 1 : vector<4x512xf32>, i32 -> vector<4x512xf32>
    %c497_i32_36 = arith.constant 497 : i32
    %48 = tpu.dynamic_rotate %5 by %c497_i32_36 dim 1 : vector<4x512xf32>, i32 -> vector<4x512xf32>
    %49 = arith.mulf %47, %46 : vector<4x512xf32>
    %c24_37 = arith.constant 24 : index
    %c0_38 = arith.constant 0 : index
    %50 = vector.load %arg11[%c24_37, %c0_38] : memref<72x512xf32, #tpu.memory_space<vmem>>, vector<4x512xf32>
    tpu.vector_store %arg11[%c24_37, %c0_38], %49 {strides = array<i32>} : memref<72x512xf32, #tpu.memory_space<vmem>>, vector<4x512xf32>,
    %51 = arith.mulf %48, %46 : vector<4x512xf32>
    %c60 = arith.constant 60 : index
    %c0_39 = arith.constant 0 : index
    %52 = vector.load %arg11[%c60, %c0_39] : memref<72x512xf32, #tpu.memory_space<vmem>>, vector<4x512xf32>
    tpu.vector_store %arg11[%c60, %c0_39], %51 {strides = array<i32>} : memref<72x512xf32, #tpu.memory_space<vmem>>, vector<4x512xf32>,
    %c28 = arith.constant 28 : index
    %c0_40 = arith.constant 0 : index
    %53 = vector.load %arg6[%c28, %c0_40] : memref<36x512xf32, #tpu.memory_space<vmem>>, vector<4x512xf32>
    %c496_i32 = arith.constant 496 : i32
    %54 = tpu.dynamic_rotate %4 by %c496_i32 dim 1 : vector<4x512xf32>, i32 -> vector<4x512xf32>
    %c496_i32_41 = arith.constant 496 : i32
    %55 = tpu.dynamic_rotate %5 by %c496_i32_41 dim 1 : vector<4x512xf32>, i32 -> vector<4x512xf32>
    %56 = arith.mulf %54, %53 : vector<4x512xf32>
    %c28_42 = arith.constant 28 : index
    %c0_43 = arith.constant 0 : index
    %57 = vector.load %arg11[%c28_42, %c0_43] : memref<72x512xf32, #tpu.memory_space<vmem>>, vector<4x512xf32>
    tpu.vector_store %arg11[%c28_42, %c0_43], %56 {strides = array<i32>} : memref<72x512xf32, #tpu.memory_space<vmem>>, vector<4x512xf32>,
    %58 = arith.mulf %55, %53 : vector<4x512xf32>
    %c64 = arith.constant 64 : index
    %c0_44 = arith.constant 0 : index
    %59 = vector.load %arg11[%c64, %c0_44] : memref<72x512xf32, #tpu.memory_space<vmem>>, vector<4x512xf32>
    tpu.vector_store %arg11[%c64, %c0_44], %58 {strides = array<i32>} : memref<72x512xf32, #tpu.memory_space<vmem>>, vector<4x512xf32>,
    %c32 = arith.constant 32 : index
    %c0_45 = arith.constant 0 : index
    %60 = vector.load %arg6[%c32, %c0_45] : memref<36x512xf32, #tpu.memory_space<vmem>>, vector<4x512xf32>
    %c495_i32 = arith.constant 495 : i32
    %61 = tpu.dynamic_rotate %4 by %c495_i32 dim 1 : vector<4x512xf32>, i32 -> vector<4x512xf32>
    %c495_i32_46 = arith.constant 495 : i32
    %62 = tpu.dynamic_rotate %5 by %c495_i32_46 dim 1 : vector<4x512xf32>, i32 -> vector<4x512xf32>
    %63 = arith.mulf %61, %60 : vector<4x512xf32>
    %c32_47 = arith.constant 32 : index
    %c0_48 = arith.constant 0 : index
    %64 = vector.load %arg11[%c32_47, %c0_48] : memref<72x512xf32, #tpu.memory_space<vmem>>, vector<4x512xf32>
    tpu.vector_store %arg11[%c32_47, %c0_48], %63 {strides = array<i32>} : memref<72x512xf32, #tpu.memory_space<vmem>>, vector<4x512xf32>,
    %65 = arith.mulf %62, %60 : vector<4x512xf32>
    %c68 = arith.constant 68 : index
    %c0_49 = arith.constant 0 : index
    %66 = vector.load %arg11[%c68, %c0_49] : memref<72x512xf32, #tpu.memory_space<vmem>>, vector<4x512xf32>
    tpu.vector_store %arg11[%c68, %c0_49], %65 {strides = array<i32>} : memref<72x512xf32, #tpu.memory_space<vmem>>, vector<4x512xf32>,
    %c0_50 = arith.constant 0 : index
    %c0_51 = arith.constant 0 : index
    %67 = vector.load %arg4[%c0_50, %c0_51] : memref<32x72xbf16, #tpu.memory_space<vmem>>, vector<32x72xbf16>
    %c0_52 = arith.constant 0 : index
    %c0_53 = arith.constant 0 : index
    %68 = vector.load %arg11[%c0_52, %c0_53] : memref<72x512xf32, #tpu.memory_space<vmem>>, vector<72x512xf32>
    %69 = arith.truncf %68 : vector<72x512xf32> to vector<72x512xbf16>
    %cst = arith.constant dense<0.000000e+00> : vector<32x512xf32>
    %70 = tpu.matmul %67, %69, %cst {dimension_numbers = #tpu.dot_dimension_numbers<[1], [0], [0], [1], [0, 0, 1, 1], [], []>} : vector<32x72xbf16>, vector<72x512xbf16>, vector<32x512xf32> -> vector<32x512xf32>
    %c0_54 = arith.constant 0 : index
    %c0_55 = arith.constant 0 : index
    %71 = vector.load %arg5[%c0_54, %c0_55] : memref<32x1xf32, #tpu.memory_space<vmem>>, vector<32x1xf32>
    %72 = vector.broadcast %71 : vector<32x1xf32> to vector<32x512xf32>
    %73 = arith.addf %70, %72 : vector<32x512xf32>
    %74 = vector.extract_strided_slice %73 {offsets = [0, 0], sizes = [8, 512], strides = [1, 1]} : vector<32x512xf32> to vector<8x512xf32>
    %75 = arith.negf %74 : vector<8x512xf32>
    %76 = math.exp %75 : vector<8x512xf32>
    %cst_56 = arith.constant 1.000000e+00 : f32
    %77 = vector.broadcast %cst_56 : f32 to vector<8x512xf32>
    %78 = arith.addf %77, %76 : vector<8x512xf32>
    %79 = arith.divf %77, %78 : vector<8x512xf32>
    %80 = vector.extract_strided_slice %73 {offsets = [8, 0], sizes = [8, 512], strides = [1, 1]} : vector<32x512xf32> to vector<8x512xf32>
    %81 = arith.negf %80 : vector<8x512xf32>
    %82 = math.exp %81 : vector<8x512xf32>
    %cst_57 = arith.constant 1.000000e+00 : f32
    %83 = vector.broadcast %cst_57 : f32 to vector<8x512xf32>
    %84 = arith.addf %83, %82 : vector<8x512xf32>
    %85 = arith.divf %83, %84 : vector<8x512xf32>
    %86 = vector.extract_strided_slice %73 {offsets = [16, 0], sizes = [8, 512], strides = [1, 1]} : vector<32x512xf32> to vector<8x512xf32>
    %87 = math.tanh %86 : vector<8x512xf32>
    %88 = vector.extract_strided_slice %73 {offsets = [24, 0], sizes = [8, 512], strides = [1, 1]} : vector<32x512xf32> to vector<8x512xf32>
    %89 = arith.negf %88 : vector<8x512xf32>
    %90 = math.exp %89 : vector<8x512xf32>
    %cst_58 = arith.constant 1.000000e+00 : f32
    %91 = vector.broadcast %cst_58 : f32 to vector<8x512xf32>
    %92 = arith.addf %91, %90 : vector<8x512xf32>
    %93 = arith.divf %91, %92 : vector<8x512xf32>
    %c0_59 = arith.constant 0 : index
    %c0_60 = arith.constant 0 : index
    %94 = vector.load %arg10[%c0_59, %c0_60] : memref<8x512xf32, #tpu.memory_space<vmem>>, vector<8x512xf32>
    %95 = arith.mulf %85, %94 : vector<8x512xf32>
    %96 = arith.mulf %79, %87 : vector<8x512xf32>
    %97 = arith.addf %95, %96 : vector<8x512xf32>
    %98 = math.tanh %97 : vector<8x512xf32>
    %99 = arith.mulf %93, %98 : vector<8x512xf32>
    %c0_61 = arith.constant 0 : index
    %c0_62 = arith.constant 0 : index
    %100 = vector.load %arg10[%c0_61, %c0_62] : memref<8x512xf32, #tpu.memory_space<vmem>>, vector<8x512xf32>
    tpu.vector_store %arg10[%c0_61, %c0_62], %97 {strides = array<i32>} : memref<8x512xf32, #tpu.memory_space<vmem>>, vector<8x512xf32>,
    %c0_63 = arith.constant 0 : index
    %c0_64 = arith.constant 0 : index
    %101 = vector.load %arg9[%c0_63, %c0_64] : memref<8x512xf32, #tpu.memory_space<vmem>>, vector<8x512xf32>
    tpu.vector_store %arg9[%c0_63, %c0_64], %99 {strides = array<i32>} : memref<8x512xf32, #tpu.memory_space<vmem>>, vector<8x512xf32>,
    %c0_65 = arith.constant 0 : index
    %c0_66 = arith.constant 0 : index
    %c0_67 = arith.constant 0 : index
    %102 = vector.load %arg7[%c0_65, %c0_66, %c0_67] : memref<1x8x512xf32, #tpu.memory_space<vmem>>, vector<1x8x512xf32>
    %103 = vector.shape_cast %102 : vector<1x8x512xf32> to vector<8x512xf32>
    %104 = vector.shape_cast %99 : vector<8x512xf32> to vector<1x8x512xf32>
    tpu.vector_store %arg7[%c0_65, %c0_66, %c0_67], %104 {strides = array<i32>} : memref<1x8x512xf32, #tpu.memory_space<vmem>>, vector<1x8x512xf32>,
    %c0_i32_68 = arith.constant 0 : i32
    %105 = arith.cmpi eq, %arg0, %c0_i32_68 : i32
    %106 = arith.extui %105 : i1 to i32
    %c0_i32_69 = arith.constant 0 : i32
    %107 = arith.cmpi ne, %106, %c0_i32_69 : i32
    scf.if %107 {
      %c0_70 = arith.constant 0 : index
      %c0_71 = arith.constant 0 : index
      %108 = vector.load %arg8[%c0_70, %c0_71] : memref<8x512xf32, #tpu.memory_space<vmem>>, vector<8x512xf32>
      tpu.vector_store %arg8[%c0_70, %c0_71], %97 {strides = array<i32>} : memref<8x512xf32, #tpu.memory_space<vmem>>, vector<8x512xf32>,
    } else {
    }
    return
  }
  func.func @transform_0(%arg0: i32) -> (i32, i32, i32) {
    %c0_i32 = arith.constant 0 : i32
    %c0_i32_0 = arith.constant 0 : i32
    %c0_i32_1 = arith.constant 0 : i32
    return %arg0, %c0_i32, %c0_i32_0 : i32, i32, i32
  }
  func.func @transform_1(%arg0: i32) -> (i32, i32) {
    %c0_i32 = arith.constant 0 : i32
    %c0_i32_0 = arith.constant 0 : i32
    %c0_i32_1 = arith.constant 0 : i32
    return %c0_i32, %c0_i32_0 : i32, i32
  }
  func.func @transform_2(%arg0: i32) -> (i32, i32) {
    %c0_i32 = arith.constant 0 : i32
    %c0_i32_0 = arith.constant 0 : i32
    %c0_i32_1 = arith.constant 0 : i32
    return %c0_i32, %c0_i32_0 : i32, i32
  }
  func.func @transform_3(%arg0: i32) -> (i32, i32) {
    %c0_i32 = arith.constant 0 : i32
    %c0_i32_0 = arith.constant 0 : i32
    %c0_i32_1 = arith.constant 0 : i32
    return %c0_i32, %c0_i32_0 : i32, i32
  }
  func.func @transform_4(%arg0: i32) -> (i32, i32) {
    %c0_i32 = arith.constant 0 : i32
    %c0_i32_0 = arith.constant 0 : i32
    %c0_i32_1 = arith.constant 0 : i32
    return %c0_i32, %c0_i32_0 : i32, i32
  }
  func.func @transform_5(%arg0: i32) -> (i32, i32) {
    %c0_i32 = arith.constant 0 : i32
    %c0_i32_0 = arith.constant 0 : i32
    %c0_i32_1 = arith.constant 0 : i32
    return %c0_i32, %c0_i32_0 : i32, i32
  }
  func.func @transform_6(%arg0: i32) -> (i32, i32, i32) {
    %c0_i32 = arith.constant 0 : i32
    %c0_i32_0 = arith.constant 0 : i32
    %c0_i32_1 = arith.constant 0 : i32
    return %arg0, %c0_i32, %c0_i32_0 : i32, i32, i32
  }
  func.func @transform_7(%arg0: i32) -> (i32, i32) {
    %c0_i32 = arith.constant 0 : i32
    %c0_i32_0 = arith.constant 0 : i32
    %c0_i32_1 = arith.constant 0 : i32
    return %c0_i32, %c0_i32_0 : i32, i32
  }
}

</mosaic_0001>

<bundles_post_ra>
// kernel: convlstm_seq_forward.1
= control target key start
LH: loop header
LB: loop body
LE: loop exit
PB: predicated region body
PF: predicated region fallthrough
CT: control target
= control target key end

     0   :  { %s1056_s9 = smov 111   ;;  %s1057_s10 = smov 112   ;;  %v70_v30 = vlaneseq  ;;  %vm709_vm4 = vcmask 1043456   ;;  %vm702_vm9 = vcmask 588800   ;;  %s1709_s1 = inlined_call_operand.vmem [shape: f32[8,512], index: 1, kind: input, shape index: {}]   ;;  %s1710_s5 = inlined_call_operand.vmem [shape: f32[36,512], index: 5, kind: input, shape index: {}]   ;;  %s1711_s0 = inlined_call_operand.vmem [shape: f32[1,4,512], index: 0, kind: input, shape index: {}]   ;;  %s1712_s3 = inlined_call_operand.vmem [shape: bf16[32,72], index: 3, kind: input, shape index: {}]   ;;  %s1713_s4 = inlined_call_operand.vmem [shape: f32[32,1], index: 4, kind: input, shape index: {}]   ;;  %s1714_s2 = inlined_call_operand.vmem [shape: f32[8,512], index: 2, kind: input, shape index: {}]   ;;  %s1715_s7 = inlined_call_operand.vmem [shape: f32[8,512], index: 7, kind: output, shape index: {1}]   ;;  %s1716_s6 = inlined_call_operand.vmem [shape: f32[1,8,512], index: 6, kind: output, shape index: {0}]  }
   0x1   :  { %v32_v0 = vld [vmem:[%s1709_s1 + $0x10] sm:$0xff]  ;;  %v30_v1 = vld [vmem:[%s1709_s1] sm:$0xff]  ;;  %v33_v2 = vld [vmem:[%s1709_s1 + $0x18] sm:$0xff]  ;;  %s1058_s14 = smov 113   ;;  %s1059_s19 = smov 1  }
   0x2   :  { %36 = vst [vmem:[#allocation2 + $0x18] sm:$0xff] %v32_v0  ;;  %34 = vst [vmem:[#allocation2 + $0x10] sm:$0xff] %v30_v1  ;;  %v31_v3 = vld [vmem:[%s1709_s1 + $0x8] sm:$0xff]  ;;  %v315_v11 = vld [vmem:[%s1710_s5 + $0x58] sm:$0xf]  ;;  %s1060_s20 = smov 127  }
   0x3   :  { %37 = vst [vmem:[#allocation2 + $0x8] sm:$0xff] %v33_v2  ;;  %35 = vst [vmem:[#allocation2] sm:$0xff] %v31_v3  ;;  %v313_v8 = vld [vmem:[%s1710_s5 + $0x48] sm:$0xf]  ;;  %v312_v13 = vld [vmem:[%s1710_s5 + $0x40] sm:$0xf] }
   0x4   :  { %v314_v14 = vld [vmem:[%s1710_s5 + $0x50] sm:$0xf]  ;;  %s1061_s21 = smov 17   ;;  %s1062_s22 = smov 15   ;;  %v1162_v20 = vld [vmem:[%s1711_s0] sm:$0xff]  ;;  %v320_v21 = vcombine.low %v312_v13, %v313_v8  ;;  %v1171_v23 = vld [vmem:[%s1711_s0 + $0x8] sm:$0xff] }
   0x5   :  { %s1063_s23 = smov 16   ;;  %v58_v22 = vcombine.high %v1162_v20, %v1162_v20  ;;  %v321_v24 = vcombine.low %v314_v14, %v315_v11  ;;  %v1179_v26 = vcombine.high %v1171_v23, %v1171_v23  ;;  %v1224_v31 = vand.u32 127, %v70_v30  ;;  %v1229_v34 = vld [vmem:[%s1710_s5 + $0x60] sm:$0xf0]  ;;  %v1238_v35 = vld [vmem:[%s1710_s5 + $0x90] sm:$0xf] }
   0x6   :  { %v324_v25 = vmul.f32 %v320_v21, %v1162_v20  ;;  %v1244_v36 = vld [vmem:[%s1710_s5 + $0x98] sm:$0xf]  ;;  %v1249_v37 = vld [vmem:[%s1710_s5 + $0x80] sm:$0xf]  ;;  %v1254_v38 = vld [vmem:[%s1710_s5 + $0x88] sm:$0xf] }
   0x7   :  { %v325_v27 = vmul.f32 %v321_v24, %v1171_v23  ;;  %vm563_vm0 = vcmp.lt.s32.totalorder %v1224_v31, 111  ;;  %vm494_vm1 = vcmp.lt.s32.totalorder %v1224_v31, 112  ;;  %v515_v41 = vrot.slane %v1229_v34, 4  ;;  %v1276_v50 = vld [vmem:[%s1710_s5 + $0x78] sm:$0xf0] }
   0x8   :  { %332 = vst [vmem:[#allocation4 + $0xf0] sm:$0xf] %v324_v25  ;;  %v328_v28 = vcombine.high %v324_v25, %v324_v25  ;;  %v1281_v51 = vld [vmem:[%s1710_s5 + $0x68] sm:$0xf0]  ;;  %v1286_v52 = vld [vmem:[%s1710_s5 + $0x70] sm:$0xf0] }
   0x9   :  { %v50_v4 = vld [vmem:[#allocation2 + $0x18] sm:$0xf]  ;;  %v48_v5 = vld [vmem:[#allocation2 + $0x10] sm:$0xf]  ;;  %v329_v29 = vcombine.high %v325_v27, %v325_v27  ;;  %334 = vst [vmem:[#allocation4 + $0xd0] sm:$0xf] %v325_v27 }
   0xa   :  { %572 = vrot.lane.b32.xlu1 %v50_v4, %s1056_s9  ;;  %568 = vrot.lane.b32.xlu0 %v48_v5, %s1056_s9  ;;  %v51_v6 = vld [vmem:[#allocation2 + $0x8] sm:$0xf]  ;;  %v49_v7 = vld [vmem:[#allocation2] sm:$0xf]  ;;  %v336_v15 = vmul.f32 %v312_v13, %v48_v5  ;;  %v338_v16 = vmul.f32 %v314_v14, %v50_v4  ;;  %333 = vst [vmem:[#allocation4 + $0x68] sm:$0xf] %v328_v28 }
   0xb   :  { %v337_v9 = vmul.f32 %v313_v8, %v49_v7  ;;  %v339_v12 = vmul.f32 %v315_v11, %v51_v6  ;;  %335 = vst [vmem:[#allocation4 + $0x28] sm:$0xf] %v329_v29  ;;  %v518_v61 = vrot.slane %v1276_v50, 4  ;;  %v516_v62 = vrot.slane %v1281_v51, 4  ;;  %v1327_v14 = vld [vmem:[%s1710_s5 + $0x78] sm:$0xf] }
   0xc   :  { %v344_v18 = vrot.slane %v336_v15, 4  ;;  %v346_v19 = vrot.slane %v338_v16, 4  ;;  %v517_v63 = vrot.slane %v1286_v52, 4  ;;  %vm437_vm2 = vcmp.lt.s32.totalorder %v1224_v31, 113  ;;  %v1332_v15 = vld [vmem:[%s1710_s5 + $0x28] sm:$0xf0] }
   0xd   :  { %v345_v10 = vrot.slane %v337_v9, 4  ;;  %v347_v17 = vrot.slane %v339_v12, 4  ;;  %v1319_v9 = vld [vmem:[%s1710_s5 + $0x60] sm:$0xf]  ;;  %v1337_v16 = vld [vmem:[%s1710_s5 + $0x68] sm:$0xf] }
   0xe   :  { %574 = vrot.lane.b32.xlu1 %v51_v6, %s1056_s9  ;;  %570 = vrot.lane.b32.xlu0 %v49_v7, %s1056_s9  ;;  %352 = vst [vmem:[#allocation4 + $0xe0] sm:$0xf0] %v344_v18  ;;  %354 = vst [vmem:[#allocation4 + $0xd8] sm:$0xf0] %v346_v19  ;;  %vm255_vm3 = vcmp.lt.s32.totalorder %v1224_v31, 1  ;;  %v277_v25 = vrot.slane %v1332_v15, 4 }
   0xf   :  { %353 = vst [vmem:[#allocation4 + $0xc8] sm:$0xf0] %v345_v10  ;;  %355 = vst [vmem:[#allocation4 + $0xc0] sm:$0xf0] %v347_v17  ;;  %v1342_v17 = vld [vmem:[%s1710_s5 + $0x70] sm:$0xf] }
  0x10   :  { %v1358_v30 = vld [vmem:[%s1710_s5 + $0x20] sm:$0xf0]  ;;  %vm368_vm5 = vcmp.lt.s32.totalorder %v1224_v31, 127  ;;  %vm72_vm6 = vcmp.lt.s32.totalorder %v1224_v31, 17  ;;  %vm198_vm7 = vcmp.lt.s32.totalorder %v1224_v31, 15  ;;  %vm129_vm8 = vcmp.lt.s32.totalorder %v1224_v31, 16 }
  0x12   :  { %501 = vrot.lane.b32.xlu1 %v49_v7, %s1057_s10  ;;  %499 = vrot.lane.b32.xlu0 %v48_v5, %s1057_s10 }
  0x16   :  { %505 = vrot.lane.b32.xlu1 %v51_v6, %s1057_s10  ;;  %503 = vrot.lane.b32.xlu0 %v50_v4, %s1057_s10 }
  0x1a   :  { %444 = vrot.lane.b32.xlu1 %v49_v7, %s1058_s14  ;;  %442 = vrot.lane.b32.xlu0 %v48_v5, %s1058_s14 }
  0x1e   :  { %448 = vrot.lane.b32.xlu1 %v51_v6, %s1058_s14  ;;  %446 = vrot.lane.b32.xlu0 %v50_v4, %s1058_s14 }
  0x22   :  { %262 = vrot.lane.b32.xlu1 %v49_v7, %s1059_s19  ;;  %260 = vrot.lane.b32.xlu0 %v48_v5, %s1059_s19 }
  0x26   :  { %266 = vrot.lane.b32.xlu1 %v51_v6, %s1059_s19  ;;  %264 = vrot.lane.b32.xlu0 %v50_v4, %s1059_s19 }
  0x2a   :  { %375 = vrot.lane.b32.xlu1 %v49_v7, %s1060_s20  ;;  %373 = vrot.lane.b32.xlu0 %v48_v5, %s1060_s20 }
  0x2e   :  { %379 = vrot.lane.b32.xlu1 %v51_v6, %s1060_s20  ;;  %377 = vrot.lane.b32.xlu0 %v50_v4, %s1060_s20 }
  0x32   :  { %79 = vrot.lane.b32.xlu1 %v49_v7, %s1061_s21  ;;  %77 = vrot.lane.b32.xlu0 %v48_v5, %s1061_s21 }
  0x36   :  { %83 = vrot.lane.b32.xlu1 %v51_v6, %s1061_s21  ;;  %81 = vrot.lane.b32.xlu0 %v50_v4, %s1061_s21 }
  0x3a   :  { %205 = vrot.lane.b32.xlu1 %v49_v7, %s1062_s22  ;;  %203 = vrot.lane.b32.xlu0 %v48_v5, %s1062_s22 }
  0x3e   :  { %209 = vrot.lane.b32.xlu1 %v51_v6, %s1062_s22  ;;  %207 = vrot.lane.b32.xlu0 %v50_v4, %s1062_s22 }
  0x42   :  { %136 = vrot.lane.b32.xlu1 %v49_v7, %s1063_s23  ;;  %134 = vrot.lane.b32.xlu0 %v48_v5, %s1063_s23  ;;  %v1064_v5 = vmov 0  }
  0x43   :  { %754 = vmatprep.mubr.bf16.mxu0 %v1064_v5  ;;  %807 = vmatprep.mubr.bf16.mxu1 %v1064_v5 }
  0x44   :  { %984 = vset.pattern.permute.xlu0 %v1064_v5  ;;  %985 = vset.pattern.permute.xlu1 %v1064_v5 }
  0x46   :  { %140 = vrot.lane.b32.xlu1 %v51_v6, %s1063_s23  ;;  %138 = vrot.lane.b32.xlu0 %v50_v4, %s1063_s23 }
  0x4a   :  { %555 = vrot.lane.b32.xlu0 %v1162_v20, %s1056_s9  ;;  %557 = vrot.lane.b32.xlu1 %v58_v22, %s1056_s9 }
  0x4e   :  { %559 = vrot.lane.b32.xlu0 %v1171_v23, %s1056_s9  ;;  %561 = vrot.lane.b32.xlu1 %v1179_v26, %s1056_s9 }
  0x52   :  { %360 = vrot.lane.b32.xlu0 %v1162_v20, %s1060_s20  ;;  %362 = vrot.lane.b32.xlu1 %v58_v22, %s1060_s20 }
  0x56   :  { %364 = vrot.lane.b32.xlu0 %v1171_v23, %s1060_s20  ;;  %366 = vrot.lane.b32.xlu1 %v1179_v26, %s1060_s20 }
  0x5a   :  { %486 = vrot.lane.b32.xlu0 %v1162_v20, %s1057_s10  ;;  %488 = vrot.lane.b32.xlu1 %v58_v22, %s1057_s10 }
  0x5e   :  { %490 = vrot.lane.b32.xlu0 %v1171_v23, %s1057_s10  ;;  %492 = vrot.lane.b32.xlu1 %v1179_v26, %s1057_s10 }
  0x62   :  { %429 = vrot.lane.b32.xlu0 %v1162_v20, %s1058_s14  ;;  %431 = vrot.lane.b32.xlu1 %v58_v22, %s1058_s14 }
  0x66   :  { %433 = vrot.lane.b32.xlu0 %v1171_v23, %s1058_s14  ;;  %435 = vrot.lane.b32.xlu1 %v1179_v26, %s1058_s14 }
  0x6a   :  { %121 = vrot.lane.b32.xlu0 %v1162_v20, %s1063_s23  ;;  %123 = vrot.lane.b32.xlu1 %v58_v22, %s1063_s23 }
  0x6e   :  { %125 = vrot.lane.b32.xlu0 %v1171_v23, %s1063_s23  ;;  %127 = vrot.lane.b32.xlu1 %v1179_v26, %s1063_s23 }
  0x72   :  { %247 = vrot.lane.b32.xlu0 %v1162_v20, %s1059_s19  ;;  %249 = vrot.lane.b32.xlu1 %v58_v22, %s1059_s19 }
  0x76   :  { %251 = vrot.lane.b32.xlu0 %v1171_v23, %s1059_s19  ;;  %253 = vrot.lane.b32.xlu1 %v1179_v26, %s1059_s19 }
  0x7a   :  { %62 = vrot.lane.b32.xlu0 %v1162_v20, %s1061_s21  ;;  %64 = vrot.lane.b32.xlu1 %v58_v22, %s1061_s21 }
  0x7c   :  { %v573_v32 = vpop.permute.xlu1 %572  ;;  %v569_v33 = vpop.permute.xlu0 %568 }
  0x7e   :  { %66 = vrot.lane.b32.xlu0 %v1171_v23, %s1061_s21  ;;  %68 = vrot.lane.b32.xlu1 %v1179_v26, %s1061_s21 }
  0x80   :  { %v575_v39 = vpop.permute.xlu1 %574  ;;  %v571_v40 = vpop.permute.xlu0 %570 }
  0x81   :  { %v576_v42 = vsel %vm563_vm0, %v573_v32, %v575_v39  ;;  %v579_v43 = vsel %vm563_vm0, %v575_v39, %v569_v33  ;;  %v577_v44 = vsel %vm563_vm0, %v571_v40, %v573_v32  ;;  %v578_v45 = vsel %vm563_vm0, %v569_v33, %v571_v40  ;;  %v1363_v32 = vld [vmem:[%s1710_s5 + $0x30] sm:$0xf0]  ;;  %v1368_v33 = vld [vmem:[%s1710_s5 + $0x38] sm:$0xf0] }
  0x82   :  { %v590_v46 = vmul.f32 %v576_v42, %v1238_v35  ;;  %v591_v47 = vmul.f32 %v579_v43, %v1244_v36  ;;  %v588_v48 = vmul.f32 %v578_v45, %v1249_v37  ;;  %v589_v49 = vmul.f32 %v577_v44, %v1254_v38  ;;  %190 = vrot.lane.b32.xlu0 %v1162_v20, %s1062_s22 }
  0x83   :  { %192 = vrot.lane.b32.xlu1 %v58_v22, %s1062_s22 }
  0x84   :  { %v598_v53 = vrot.slane %v590_v46, 4  ;;  %v599_v54 = vrot.slane %v591_v47, 4  ;;  %v596_v55 = vrot.slane %v588_v48, 4  ;;  %v597_v56 = vrot.slane %v589_v49, 4  ;;  %v502_v57 = vpop.permute.xlu1 %501  ;;  %v500_v58 = vpop.permute.xlu0 %499  ;;  %v668_v49 = vld [vmem:[%s1713_s4] sm:$0xff] }
  0x85   :  { %v509_v59 = vsel %vm494_vm1, %v500_v58, %v502_v57 }
  0x86   :  { %606 = vst [vmem:[#allocation4 + $0x108] sm:$0xf0] %v598_v53  ;;  %607 = vst [vmem:[#allocation4 + $0x48] sm:$0xf0] %v599_v54  ;;  %v543_v60 = vmul.f32 %v515_v41, %v509_v59  ;;  %194 = vrot.lane.b32.xlu0 %v1171_v23, %s1062_s22  ;;  %v669_v53 = vld [vmem:[%s1713_s4 + $0x8] sm:$0xff] }
  0x87   :  { %604 = vst [vmem:[#allocation4 + $0x8] sm:$0xf0] %v596_v55  ;;  %605 = vst [vmem:[#allocation4 + $0xa8] sm:$0xf0] %v597_v56  ;;  %196 = vrot.lane.b32.xlu1 %v1179_v26, %s1062_s22 }
  0x88   :  { %547 = vst [vmem:[#allocation4 + $0x8] sm:$0xf] %v543_v60  ;;  %v506_v0 = vpop.permute.xlu1 %505  ;;  %v504_v1 = vpop.permute.xlu0 %503  ;;  %v278_v60 = vrot.slane %v1363_v32, 4 }
  0x89   :  { %v510_v2 = vsel %vm494_vm1, %v506_v0, %v500_v58  ;;  %v507_v3 = vsel %vm494_vm1, %v504_v1, %v506_v0  ;;  %v508_v4 = vsel %vm494_vm1, %v502_v57, %v504_v1  ;;  %v276_v57 = vrot.slane %v1358_v30, 4  ;;  %v671_v1 = vld [vmem:[%s1713_s4 + $0x18] sm:$0xff] }
  0x8a   :  { %v546_v6 = vmul.f32 %v518_v61, %v510_v2  ;;  %v544_v7 = vmul.f32 %v516_v62, %v508_v4  ;;  %v545_v8 = vmul.f32 %v517_v63, %v507_v3  ;;  %674 = vperm.xlu0 %984, %v668_v49   ;;  %v279_v0 = vrot.slane %v1368_v33, 4  ;;  %v670_v2 = vld [vmem:[%s1713_s4 + $0x10] sm:$0xff]  ;;  %v1396_v4 = vld [vmem:[%s1710_s5 + $0x40] sm:$0xf0]  ;;  %v1450_v49 = vld [vmem:[%s1710_s5 + $0x8] sm:$0xf] }
  0x8b   :  { %679 = vperm.xlu1 %985, %v669_v53  }
  0x8c   :  { %550 = vst [vmem:[#allocation4 + $0x48] sm:$0xf] %v546_v6  ;;  %548 = vst [vmem:[#allocation4 + $0xa8] sm:$0xf] %v544_v7  ;;  %v445_v10 = vpop.permute.xlu1 %444  ;;  %v443_v11 = vpop.permute.xlu0 %442 }
  0x8d   :  { %549 = vst [vmem:[#allocation4 + $0x108] sm:$0xf] %v545_v8  ;;  %v452_v12 = vsel %vm437_vm2, %v443_v11, %v445_v10 }
  0x8e   :  { %v462_v13 = vmul.f32 %v452_v12, %v1319_v9  ;;  %689 = vperm.xlu0 %984, %v671_v1   ;;  %v1468_v1 = vld [vmem:[%s1710_s5 + $0x18] sm:$0xf] }
  0x8f   :  { %v644_v18 = vld [vmem:[#allocation4 + $0x8] sm:$0xff]  ;;  %684 = vperm.xlu1 %985, %v670_v2  }
  0x90   :  { %v470_v19 = vrot.slane %v462_v13, 4  ;;  %v449_v20 = vpop.permute.xlu1 %448  ;;  %v447_v21 = vpop.permute.xlu0 %446  ;;  %v664_v29 = vpack.c.bf16 %v644_v18, %v644_v18 }
  0x91   :  { %v453_v22 = vsel %vm437_vm2, %v449_v20, %v443_v11  ;;  %v450_v23 = vsel %vm437_vm2, %v447_v21, %v449_v20  ;;  %v451_v24 = vsel %vm437_vm2, %v445_v10, %v447_v21  ;;  %v1415_v20 = vld [vmem:[%s1710_s5 + $0x58] sm:$0xf0]  ;;  %v1420_v21 = vld [vmem:[%s1710_s5 + $0x48] sm:$0xf0] }
  0x92   :  { %478 = vst [vmem:[#allocation4 + $0x50] sm:$0xf0] %v470_v19  ;;  %v465_v26 = vmul.f32 %v453_v22, %v1327_v14  ;;  %v463_v27 = vmul.f32 %v451_v24, %v1337_v16  ;;  %v464_v28 = vmul.f32 %v450_v23, %v1342_v17  ;;  %v711_v59 = vsel %vm709_vm4, %v664_v29, 0  ;;  %v1425_v22 = vld [vmem:[%s1710_s5 + $0x50] sm:$0xf0] }
  0x93   :  { %v645_v39 = vld [vmem:[#allocation4 + $0xa8] sm:$0xff]  ;;  %v389_v19 = vrot.slane %v1396_v4, 4  ;;  %v390_v29 = vrot.slane %v1420_v21, 4 }
  0x94   :  { %v647_v40 = vld [vmem:[#allocation4 + $0x48] sm:$0xff]  ;;  %v473_v43 = vrot.slane %v465_v26, 4  ;;  %v471_v44 = vrot.slane %v463_v27, 4  ;;  %v472_v45 = vrot.slane %v464_v28, 4  ;;  %v263_v46 = vpop.permute.xlu1 %262  ;;  %v261_v47 = vpop.permute.xlu0 %260  ;;  %v665_v48 = vpack.c.bf16 %v645_v39, %v645_v39 }
  0x95   :  { %v646_v42 = vld [vmem:[#allocation4 + $0x108] sm:$0xff]  ;;  %v270_v54 = vsel %vm255_vm3, %v261_v47, %v263_v46  ;;  %v667_v55 = vpack.c.bf16 %v647_v40, %v647_v40  ;;  %v392_v28 = vrot.slane %v1415_v20, 4  ;;  %v391_v39 = vrot.slane %v1425_v22, 4 }
  0x96   :  { %v666_v56 = vpack.c.bf16 %v646_v42, %v646_v42  ;;  %481 = vst [vmem:[#allocation4 + $0x40] sm:$0xf0] %v473_v43  ;;  %479 = vst [vmem:[#allocation4 + $0x30] sm:$0xf0] %v471_v44  ;;  %v305_v58 = vmul.f32 %v277_v25, %v270_v54  ;;  %957 = vmatprep.subr.msk.bf16.mxu0 %vm709_vm4, %v665_v48 }
  0x97   :  { %480 = vst [vmem:[#allocation4 + $0xf8] sm:$0xf0] %v472_v45  ;;  %960 = vmatprep.subr.msk.bf16.mxu1 %vm709_vm4, %v667_v55  ;;  %729 = vmatpush1.bf16.msra.mxu0 %v711_v59  ;;  %v1463_v59 = vld [vmem:[%s1710_s5 + $0x10] sm:$0xf] }
  0x98   :  { %v717_v3 = vsel %vm709_vm4, %v666_v56, 0  ;;  %309 = vst [vmem:[#allocation4 + $0xc8] sm:$0xf] %v305_v58  ;;  %v267_v6 = vpop.permute.xlu1 %266  ;;  %v265_v7 = vpop.permute.xlu0 %264  ;;  %v1458_v58 = vld [vmem:[%s1710_s5] sm:$0xf] }
  0x99   :  { %782 = vmatpush1.bf16.msra.mxu1 %v717_v3  ;;  %v271_v8 = vsel %vm255_vm3, %v267_v6, %v261_v47  ;;  %v268_v10 = vsel %vm255_vm3, %v265_v7, %v267_v6  ;;  %v269_v11 = vsel %vm255_vm3, %v263_v46, %v265_v7 }
  0x9a   :  { %v304_v12 = vmul.f32 %v276_v57, %v271_v8  ;;  %v306_v13 = vmul.f32 %v278_v60, %v269_v11  ;;  %v307_v18 = vmul.f32 %v279_v0, %v268_v10 }
  0x9c   :  { %308 = vst [vmem:[#allocation4 + $0xe0] sm:$0xf] %v304_v12  ;;  %310 = vst [vmem:[#allocation4 + $0xd8] sm:$0xf] %v306_v13  ;;  %v376_v23 = vpop.permute.xlu1 %375  ;;  %v374_v24 = vpop.permute.xlu0 %373 }
  0x9d   :  { %311 = vst [vmem:[#allocation4 + $0xc0] sm:$0xf] %v307_v18  ;;  %v383_v26 = vsel %vm368_vm5, %v374_v24, %v376_v23  ;;  %v1482_v18 = vld [vmem:[%s1710_s5 + $0x28] sm:$0xf] }
  0x9e   :  { %v417_v27 = vmul.f32 %v389_v19, %v383_v26 }
  0xa0   :  { %421 = vst [vmem:[#allocation4 + $0x50] sm:$0xf] %v417_v27  ;;  %v380_v40 = vpop.permute.xlu1 %379  ;;  %v378_v42 = vpop.permute.xlu0 %377 }
  0xa1   :  { %v384_v43 = vsel %vm368_vm5, %v380_v40, %v374_v24  ;;  %v381_v44 = vsel %vm368_vm5, %v378_v42, %v380_v40  ;;  %v382_v45 = vsel %vm368_vm5, %v376_v23, %v378_v42  ;;  %v637_v23 = vld [vmem:[#allocation4 + $0xc8] sm:$0xff] }
  0xa2   :  { %v420_v46 = vmul.f32 %v392_v28, %v384_v43  ;;  %v418_v47 = vmul.f32 %v390_v29, %v382_v45  ;;  %v419_v48 = vmul.f32 %v391_v39, %v381_v44 }
  0xa4   :  { %424 = vst [vmem:[#allocation4 + $0x40] sm:$0xf] %v420_v46  ;;  %422 = vst [vmem:[#allocation4 + $0x30] sm:$0xf] %v418_v47  ;;  %v80_v53 = vpop.permute.xlu1 %79  ;;  %v78_v54 = vpop.permute.xlu0 %77 }
  0xa5   :  { %423 = vst [vmem:[#allocation4 + $0xf8] sm:$0xf] %v419_v48  ;;  %v87_v55 = vsel %vm72_vm6, %v78_v54, %v80_v53  ;;  %v639_v48 = vld [vmem:[#allocation4 + $0xc0] sm:$0xff] }
  0xa6   :  { %v98_v56 = vmul.f32 %v87_v55, %v1450_v49 }
  0xa7   :  { %v640_v24 = vld [vmem:[#allocation4 + $0x50] sm:$0xff] }
  0xa8   :  { %v106_v2 = vrot.slane %v98_v56, 4  ;;  %v84_v3 = vpop.permute.xlu1 %83  ;;  %v82_v6 = vpop.permute.xlu0 %81 }
  0xa9   :  { %v88_v7 = vsel %vm72_vm6, %v84_v3, %v78_v54  ;;  %v85_v8 = vsel %vm72_vm6, %v82_v6, %v84_v3  ;;  %v86_v10 = vsel %vm72_vm6, %v80_v53, %v82_v6  ;;  %v636_v53 = vld [vmem:[#allocation4 + $0xe0] sm:$0xff]  ;;  %v638_v54 = vld [vmem:[#allocation4 + $0xd8] sm:$0xff] }
  0xaa   :  { %114 = vst [vmem:[#allocation4 + $0x70] sm:$0xf0] %v106_v2  ;;  %v97_v11 = vmul.f32 %v88_v7, %v1458_v58  ;;  %v99_v12 = vmul.f32 %v86_v10, %v1463_v59  ;;  %v100_v13 = vmul.f32 %v85_v8, %v1468_v1  ;;  %v660_v2 = vpack.c.bf16 %v640_v24, %v636_v53  ;;  %v1491_v7 = vld [vmem:[%s1710_s5 + $0x20] sm:$0xf]  ;;  %v1496_v8 = vld [vmem:[%s1710_s5 + $0x30] sm:$0xf] }
  0xab   :  { %v641_v26 = vld [vmem:[#allocation4 + $0x30] sm:$0xff]  ;;  %v643_v27 = vld [vmem:[#allocation4 + $0x40] sm:$0xff]  ;;  %v1501_v10 = vld [vmem:[%s1710_s5 + $0x38] sm:$0xf] }
  0xac   :  { %v642_v40 = vld [vmem:[#allocation4 + $0xf8] sm:$0xff]  ;;  %v105_v42 = vrot.slane %v97_v11, 4  ;;  %v107_v43 = vrot.slane %v99_v12, 4  ;;  %v108_v44 = vrot.slane %v100_v13, 4  ;;  %v206_v45 = vpop.permute.xlu1 %205  ;;  %v204_v46 = vpop.permute.xlu0 %203  ;;  %v661_v47 = vpack.c.bf16 %v641_v26, %v637_v23  ;;  %v1506_v11 = vld [vmem:[%s1710_s5 + $0x8] sm:$0xf0] }
  0xad   :  { %v213_v55 = vsel %vm198_vm7, %v204_v46, %v206_v45  ;;  %v663_v56 = vpack.c.bf16 %v643_v27, %v639_v48  ;;  %v662_v3 = vpack.c.bf16 %v642_v40, %v638_v54 }
  0xae   :  { %113 = vst [vmem:[#allocation4 + $0x20] sm:$0xf0] %v105_v42  ;;  %115 = vst [vmem:[#allocation4 + $0x78] sm:$0xf0] %v107_v43  ;;  %v224_v6 = vmul.f32 %v213_v55, %v1482_v18  ;;  %730 = vmatprep.subr.bf16.mxu0 %v661_v47  ;;  %v1532_v47 = vld [vmem:[%s1710_s5 + $0x18] sm:$0xf0] }
  0xaf   :  { %116 = vst [vmem:[#allocation4 + $0x38] sm:$0xf0] %v108_v44  ;;  %783 = vmatprep.subr.bf16.mxu1 %v663_v56  ;;  %731 = vmatpush1.bf16.msra.mxu0 %v660_v2  ;;  %v151_v44 = vrot.slane %v1506_v11, 4 }
  0xb0   :  { %v232_v12 = vrot.slane %v224_v6, 4  ;;  %784 = vmatpush1.bf16.msra.mxu1 %v662_v3  ;;  %v210_v13 = vpop.permute.xlu1 %209  ;;  %v208_v23 = vpop.permute.xlu0 %207 }
  0xb1   :  { %v214_v24 = vsel %vm198_vm7, %v210_v13, %v204_v46  ;;  %v211_v26 = vsel %vm198_vm7, %v208_v23, %v210_v13  ;;  %v212_v27 = vsel %vm198_vm7, %v206_v45, %v208_v23  ;;  %v1522_v46 = vld [vmem:[%s1710_s5] sm:$0xf0]  ;;  %v1527_v45 = vld [vmem:[%s1710_s5 + $0x10] sm:$0xf0]  ;;  %v153_v13 = vrot.slane %v1532_v47, 4 }
  0xb2   :  { %240 = vst [vmem:[#allocation4 + $0x60] sm:$0xf0] %v232_v12  ;;  %v223_v40 = vmul.f32 %v214_v24, %v1491_v7  ;;  %v225_v42 = vmul.f32 %v212_v27, %v1496_v8  ;;  %v226_v43 = vmul.f32 %v211_v26, %v1501_v10  ;;  %v150_v6 = vrot.slane %v1522_v46, 4 }
  0xb3   :  { %v152_v12 = vrot.slane %v1527_v45, 4 }
  0xb4   :  { %v231_v48 = vrot.slane %v223_v40, 4  ;;  %v233_v53 = vrot.slane %v225_v42, 4  ;;  %v234_v54 = vrot.slane %v226_v43, 4  ;;  %v137_v55 = vpop.permute.xlu1 %136  ;;  %v135_v56 = vpop.permute.xlu0 %134 }
  0xb5   :  { %v144_v2 = vsel %vm129_vm8, %v135_v56, %v137_v55 }
  0xb6   :  { %239 = vst [vmem:[#allocation4 + $0x100] sm:$0xf0] %v231_v48  ;;  %241 = vst [vmem:[#allocation4 + $0x90] sm:$0xf0] %v233_v53  ;;  %v179_v3 = vmul.f32 %v151_v44, %v144_v2 }
  0xb7   :  { %242 = vst [vmem:[#allocation4 + $0x58] sm:$0xf0] %v234_v54 }
  0xb8   :  { %183 = vst [vmem:[#allocation4 + $0x60] sm:$0xf] %v179_v3  ;;  %v141_v23 = vpop.permute.xlu1 %140  ;;  %v139_v24 = vpop.permute.xlu0 %138 }
  0xb9   :  { %v145_v26 = vsel %vm129_vm8, %v141_v23, %v135_v56  ;;  %v142_v27 = vsel %vm129_vm8, %v139_v24, %v141_v23  ;;  %v143_v40 = vsel %vm129_vm8, %v137_v55, %v139_v24 }
  0xba   :  { %v178_v42 = vmul.f32 %v150_v6, %v145_v26  ;;  %v180_v43 = vmul.f32 %v152_v12, %v143_v40  ;;  %v181_v48 = vmul.f32 %v153_v13, %v142_v27 }
  0xbc   :  { %182 = vst [vmem:[#allocation4 + $0x100] sm:$0xf] %v178_v42  ;;  %184 = vst [vmem:[#allocation4 + $0x90] sm:$0xf] %v180_v43  ;;  %v556_v53 = vpop.permute.xlu0 %555  ;;  %v558_v54 = vpop.permute.xlu1 %557 }
  0xbd   :  { %185 = vst [vmem:[#allocation4 + $0x58] sm:$0xf] %v181_v48  ;;  %v566_v56 = vsel %vm563_vm0, %v556_v53, %v558_v54 }
  0xbe   :  { %v580_v2 = vmul.f32 %v566_v56, %v1249_v37 }
  0xc0   :  { %584 = vst [vmem:[#allocation4 + $0x20] sm:$0xf] %v580_v2  ;;  %v560_v55 = vpop.permute.xlu0 %559  ;;  %v562_v3 = vpop.permute.xlu1 %561 }
  0xc1   :  { %v565_v23 = vsel %vm563_vm0, %v558_v54, %v560_v55  ;;  %v564_v24 = vsel %vm563_vm0, %v560_v55, %v562_v3  ;;  %v567_v26 = vsel %vm563_vm0, %v562_v3, %v556_v53  ;;  %v633_v3 = vld [vmem:[#allocation4 + $0x60] sm:$0xff] }
  0xc2   :  { %v581_v27 = vmul.f32 %v565_v23, %v1254_v38  ;;  %v582_v40 = vmul.f32 %v564_v24, %v1238_v35  ;;  %v583_v42 = vmul.f32 %v567_v26, %v1244_v36 }
  0xc3   :  { %v632_v21 = vld [vmem:[#allocation4 + $0x100] sm:$0xff] }
  0xc4   :  { %585 = vst [vmem:[#allocation4 + $0x70] sm:$0xf] %v581_v27  ;;  %586 = vst [vmem:[#allocation4 + $0x78] sm:$0xf] %v582_v40  ;;  %v361_v37 = vpop.permute.xlu0 %360  ;;  %v363_v43 = vpop.permute.xlu1 %362 }
  0xc5   :  { %587 = vst [vmem:[#allocation4 + $0x38] sm:$0xf] %v583_v42  ;;  %v371_v48 = vsel %vm368_vm5, %v361_v37, %v363_v43 }
  0xc6   :  { %v397_v54 = vmul.f32 %v389_v19, %v371_v48 }
  0xc7   :  { %v628_v23 = vld [vmem:[#allocation4 + $0x20] sm:$0xff] }
  0xc8   :  { %v405_v56 = vrot.slane %v397_v54, 4  ;;  %v365_v2 = vpop.permute.xlu0 %364  ;;  %v367_v53 = vpop.permute.xlu1 %366  ;;  %v656_v20 = vpack.c.bf16 %v632_v21, %v628_v23 }
  0xc9   :  { %v370_v38 = vsel %vm368_vm5, %v363_v43, %v365_v2  ;;  %v369_v35 = vsel %vm368_vm5, %v365_v2, %v367_v53  ;;  %v372_v36 = vsel %vm368_vm5, %v367_v53, %v361_v37 }
  0xca   :  { %413 = vst [vmem:[#allocation4 + $0xf0] sm:$0xf0] %v405_v56  ;;  %v398_v55 = vmul.f32 %v390_v29, %v370_v38  ;;  %v399_v4 = vmul.f32 %v391_v39, %v369_v35  ;;  %v400_v19 = vmul.f32 %v392_v28, %v372_v36  ;;  %v635_v56 = vld [vmem:[#allocation4 + $0x58] sm:$0xff]  ;;  %v634_v29 = vld [vmem:[#allocation4 + $0x90] sm:$0xff] }
  0xcb   :  { %v629_v24 = vld [vmem:[#allocation4 + $0x70] sm:$0xff]  ;;  %v630_v27 = vld [vmem:[#allocation4 + $0x78] sm:$0xff] }
  0xcc   :  { %v631_v26 = vld [vmem:[#allocation4 + $0x38] sm:$0xff]  ;;  %v406_v40 = vrot.slane %v398_v55, 4  ;;  %v407_v42 = vrot.slane %v399_v4, 4  ;;  %v408_v43 = vrot.slane %v400_v19, 4  ;;  %v487_v48 = vpop.permute.xlu0 %486  ;;  %v489_v37 = vpop.permute.xlu1 %488  ;;  %v657_v54 = vpack.c.bf16 %v633_v3, %v629_v24 }
  0xcd   :  { %v497_v22 = vsel %vm494_vm1, %v487_v48, %v489_v37  ;;  %v659_v39 = vpack.c.bf16 %v635_v56, %v631_v26  ;;  %v658_v28 = vpack.c.bf16 %v634_v29, %v630_v27 }
  0xce   :  { %414 = vst [vmem:[#allocation4 + $0x68] sm:$0xf0] %v406_v40  ;;  %415 = vst [vmem:[#allocation4 + $0xd0] sm:$0xf0] %v407_v42  ;;  %v523_v2 = vmul.f32 %v515_v41, %v497_v22  ;;  %732 = vmatprep.subr.bf16.mxu0 %v657_v54 }
  0xcf   :  { %416 = vst [vmem:[#allocation4 + $0x28] sm:$0xf0] %v408_v43  ;;  %785 = vmatprep.subr.bf16.mxu1 %v659_v39  ;;  %733 = vmatpush1.bf16.msra.mxu0 %v656_v20 }
  0xd0   :  { %v531_v53 = vrot.slane %v523_v2, 4  ;;  %786 = vmatpush1.bf16.msra.mxu1 %v658_v28  ;;  %v491_v38 = vpop.permute.xlu0 %490  ;;  %v493_v35 = vpop.permute.xlu1 %492 }
  0xd1   :  { %v496_v36 = vsel %vm494_vm1, %v489_v37, %v491_v38  ;;  %v495_v55 = vsel %vm494_vm1, %v491_v38, %v493_v35  ;;  %v498_v4 = vsel %vm494_vm1, %v493_v35, %v487_v48  ;;  %v620_v45 = vld [vmem:[#allocation4 + $0xf0] sm:$0xff] }
  0xd2   :  { %539 = vst [vmem:[#allocation4 + $0xe8] sm:$0xf0] %v531_v53  ;;  %v524_v34 = vmul.f32 %v516_v62, %v496_v36  ;;  %v525_v41 = vmul.f32 %v517_v63, %v495_v55  ;;  %v526_v19 = vmul.f32 %v518_v61, %v498_v4 }
  0xd4   :  { %v532_v3 = vrot.slane %v524_v34, 4  ;;  %v533_v23 = vrot.slane %v525_v41, 4  ;;  %v534_v24 = vrot.slane %v526_v19, 4  ;;  %v430_v26 = vpop.permute.xlu0 %429  ;;  %v432_v27 = vpop.permute.xlu1 %431 }
  0xd5   :  { %v440_v40 = vsel %vm437_vm2, %v430_v26, %v432_v27  ;;  %v621_v20 = vld [vmem:[#allocation4 + $0x68] sm:$0xff] }
  0xd6   :  { %540 = vst [vmem:[#allocation4 + $0x18] sm:$0xf0] %v532_v3  ;;  %541 = vst [vmem:[#allocation4 + $0xb0] sm:$0xf0] %v533_v23  ;;  %v454_v51 = vmul.f32 %v440_v40, %v1319_v9  ;;  %v623_v19 = vld [vmem:[#allocation4 + $0x28] sm:$0xff] }
  0xd7   :  { %542 = vst [vmem:[#allocation4 + $0xb8] sm:$0xf0] %v534_v24 }
  0xd8   :  { %458 = vst [vmem:[#allocation4 + $0xe8] sm:$0xf] %v454_v51  ;;  %v434_v62 = vpop.permute.xlu0 %433  ;;  %v436_v52 = vpop.permute.xlu1 %435 }
  0xd9   :  { %v439_v50 = vsel %vm437_vm2, %v432_v27, %v434_v62  ;;  %v438_v61 = vsel %vm437_vm2, %v434_v62, %v436_v52  ;;  %v441_v63 = vsel %vm437_vm2, %v436_v52, %v430_v26 }
  0xda   :  { %v455_v42 = vmul.f32 %v439_v50, %v1337_v16  ;;  %v456_v43 = vmul.f32 %v438_v61, %v1342_v17  ;;  %v457_v48 = vmul.f32 %v441_v63, %v1327_v14 }
  0xdc   :  { %459 = vst [vmem:[#allocation4 + $0x18] sm:$0xf] %v455_v42  ;;  %460 = vst [vmem:[#allocation4 + $0xb0] sm:$0xf] %v456_v43  ;;  %v122_v9 = vpop.permute.xlu0 %121  ;;  %v124_v37 = vpop.permute.xlu1 %123 }
  0xdd   :  { %461 = vst [vmem:[#allocation4 + $0xb8] sm:$0xf] %v457_v48  ;;  %v132_v54 = vsel %vm129_vm8, %v122_v9, %v124_v37 }
  0xde   :  { %v159_v56 = vmul.f32 %v151_v44, %v132_v54 }
  0xdf   :  { %v624_v28 = vld [vmem:[#allocation4 + $0xe8] sm:$0xff] }
  0xe0   :  { %v167_v21 = vrot.slane %v159_v56, 4  ;;  %v126_v29 = vpop.permute.xlu0 %125  ;;  %v128_v22 = vpop.permute.xlu1 %127  ;;  %v652_v47 = vpack.c.bf16 %v624_v28, %v620_v45 }
  0xe1   :  { %v131_v16 = vsel %vm129_vm8, %v124_v37, %v126_v29  ;;  %v130_v14 = vsel %vm129_vm8, %v126_v29, %v128_v22  ;;  %v133_v17 = vsel %vm129_vm8, %v128_v22, %v122_v9 }
  0xe2   :  { %175 = vst [vmem:[#allocation4 + $0x98] sm:$0xf0] %v167_v21  ;;  %v160_v39 = vmul.f32 %v152_v12, %v131_v16  ;;  %v158_v11 = vmul.f32 %v150_v6, %v133_v17  ;;  %v161_v44 = vmul.f32 %v153_v13, %v130_v14  ;;  %v622_v12 = vld [vmem:[#allocation4 + $0xd0] sm:$0xff] }
  0xe3   :  { %v625_v2 = vld [vmem:[#allocation4 + $0x18] sm:$0xff]  ;;  %v626_v38 = vld [vmem:[#allocation4 + $0xb0] sm:$0xff] }
  0xe4   :  { %v627_v53 = vld [vmem:[#allocation4 + $0xb8] sm:$0xff]  ;;  %v168_v35 = vrot.slane %v160_v39, 4  ;;  %v166_v36 = vrot.slane %v158_v11, 4  ;;  %v169_v55 = vrot.slane %v161_v44, 4  ;;  %v248_v4 = vpop.permute.xlu0 %247  ;;  %v250_v34 = vpop.permute.xlu1 %249  ;;  %v653_v41 = vpack.c.bf16 %v625_v2, %v621_v20 }
  0xe5   :  { %v258_v46 = vsel %vm255_vm3, %v248_v4, %v250_v34  ;;  %v655_v6 = vpack.c.bf16 %v627_v53, %v623_v19  ;;  %v654_v13 = vpack.c.bf16 %v626_v38, %v622_v12 }
  0xe6   :  { %176 = vst [vmem:[#allocation4 + $0x110] sm:$0xf0] %v168_v35  ;;  %174 = vst [vmem:[#allocation4] sm:$0xf0] %v166_v36  ;;  %v285_v3 = vmul.f32 %v277_v25, %v258_v46  ;;  %734 = vmatprep.subr.bf16.mxu0 %v653_v41 }
  0xe7   :  { %177 = vst [vmem:[#allocation4 + $0x88] sm:$0xf0] %v169_v55  ;;  %787 = vmatprep.subr.bf16.mxu1 %v655_v6  ;;  %735 = vmatpush1.bf16.msra.mxu0 %v652_v47 }
  0xe8   :  { %v293_v23 = vrot.slane %v285_v3, 4  ;;  %788 = vmatpush1.bf16.msra.mxu1 %v654_v13  ;;  %v252_v24 = vpop.permute.xlu0 %251  ;;  %v254_v26 = vpop.permute.xlu1 %253 }
  0xe9   :  { %v257_v27 = vsel %vm255_vm3, %v250_v34, %v252_v24  ;;  %v256_v40 = vsel %vm255_vm3, %v252_v24, %v254_v26  ;;  %v259_v51 = vsel %vm255_vm3, %v254_v26, %v248_v4 }
  0xea   :  { %301 = vst [vmem:[#allocation4 + $0x10] sm:$0xf0] %v293_v23  ;;  %v286_v15 = vmul.f32 %v278_v60, %v257_v27  ;;  %v284_v25 = vmul.f32 %v276_v57, %v259_v51  ;;  %v287_v62 = vmul.f32 %v279_v0, %v256_v40 }
  0xec   :  { %v294_v52 = vrot.slane %v286_v15, 4  ;;  %v292_v50 = vrot.slane %v284_v25, 4  ;;  %v295_v61 = vrot.slane %v287_v62, 4  ;;  %v63_v63 = vpop.permute.xlu0 %62  ;;  %v65_v42 = vpop.permute.xlu1 %64 }
  0xed   :  { %v75_v43 = vsel %vm72_vm6, %v63_v63, %v65_v42 }
  0xee   :  { %302 = vst [vmem:[#allocation4 + $0x118] sm:$0xf0] %v294_v52  ;;  %300 = vst [vmem:[#allocation4 + $0x80] sm:$0xf0] %v292_v50  ;;  %v90_v32 = vmul.f32 %v75_v43, %v1450_v49 }
  0xef   :  { %303 = vst [vmem:[#allocation4 + $0xa0] sm:$0xf0] %v295_v61 }
  0xf0   :  { %94 = vst [vmem:[#allocation4 + $0x98] sm:$0xf] %v90_v32  ;;  %v67_v60 = vpop.permute.xlu0 %66  ;;  %v69_v30 = vpop.permute.xlu1 %68 }
  0xf1   :  { %v74_v33 = vsel %vm72_vm6, %v65_v42, %v67_v60  ;;  %v73_v57 = vsel %vm72_vm6, %v67_v60, %v69_v30  ;;  %v76_v0 = vsel %vm72_vm6, %v69_v30, %v63_v63 }
  0xf2   :  { %v91_v48 = vmul.f32 %v74_v33, %v1463_v59  ;;  %v89_v9 = vmul.f32 %v76_v0, %v1458_v58  ;;  %v92_v37 = vmul.f32 %v73_v57, %v1468_v1 }
  0xf4   :  { %95 = vst [vmem:[#allocation4 + $0x110] sm:$0xf] %v91_v48  ;;  %93 = vst [vmem:[#allocation4] sm:$0xf] %v89_v9  ;;  %v191_v49 = vpop.permute.xlu0 %190 }
  0xf5   :  { %96 = vst [vmem:[#allocation4 + $0x88] sm:$0xf] %v92_v37  ;;  %v193_v54 = vpop.permute.xlu1 %192 }
  0xf6   :  { %v201_v56 = vsel %vm198_vm7, %v191_v49, %v193_v54 }
  0xf7   :  { %v216_v21 = vmul.f32 %v201_v56, %v1482_v18  ;;  %v613_v18 = vld [vmem:[#allocation4 + $0x98] sm:$0xff] }
  0xf8   :  { %v195_v29 = vpop.permute.xlu0 %194 }
  0xf9   :  { %220 = vst [vmem:[#allocation4 + $0x10] sm:$0xf] %v216_v21  ;;  %v200_v22 = vsel %vm198_vm7, %v193_v54, %v195_v29  ;;  %v197_v59 = vpop.permute.xlu1 %196 }
  0xfa   :  { %v217_v58 = vmul.f32 %v200_v22, %v1496_v8  ;;  %v199_v1 = vsel %vm198_vm7, %v195_v29, %v197_v59  ;;  %v202_v16 = vsel %vm198_vm7, %v197_v59, %v191_v49 }
  0xfb   :  { %v215_v14 = vmul.f32 %v202_v16, %v1491_v7  ;;  %v218_v17 = vmul.f32 %v199_v1, %v1501_v10  ;;  %v612_v44 = vld [vmem:[#allocation4] sm:$0xff]  ;;  %v614_v20 = vld [vmem:[#allocation4 + $0x110] sm:$0xff]  ;;  %v991_v10 = vld [vmem:[%s1712_s3 + $0x8] sm:$0xff]  }
  0xfc   :  { %221 = vst [vmem:[#allocation4 + $0x118] sm:$0xf] %v217_v58  ;;  %v615_v2 = vld [vmem:[#allocation4 + $0x88] sm:$0xff]  ;;  %v990_v7 = vld [vmem:[%s1712_s3] sm:$0xff]  }
  0xfd   :  { %219 = vst [vmem:[#allocation4 + $0x80] sm:$0xf] %v215_v14  ;;  %222 = vst [vmem:[#allocation4 + $0xa0] sm:$0xf] %v218_v17 }
 0x100   :  { %v617_v39 = vld [vmem:[#allocation4 + $0x10] sm:$0xff] }
 0x101   :  { %v649_v11 = vpack.c.bf16 %v617_v39, %v613_v18 }
 0x103   :  { %736 = vmatprep.subr.bf16.mxu0 %v649_v11  ;;  %v618_v8 = vld [vmem:[#allocation4 + $0x118] sm:$0xff] }
 0x104   :  { %v616_v28 = vld [vmem:[#allocation4 + $0x80] sm:$0xff]  ;;  %v650_v38 = vpack.c.bf16 %v618_v8, %v614_v20 }
 0x105   :  { %v619_v53 = vld [vmem:[#allocation4 + $0xa0] sm:$0xff]  ;;  %v648_v31 = vpack.c.bf16 %v616_v28, %v612_v44  ;;  %v675_v36 = vpop.permute.xlu0 %674 }
 0x106   :  { %v651_v35 = vpack.c.bf16 %v619_v53, %v615_v2  ;;  %v680_v4 = vpop.permute.xlu1 %679 }
 0x107   :  { %737 = vmatpush1.bf16.msra.mxu0 %v648_v31 }
 0x108   :  { %789 = vmatprep.subr.bf16.mxu1 %v651_v35 }
 0x109   :  { %790 = vmatpush1.bf16.msra.mxu1 %v650_v38  ;;  %v690_v0 = vpop.permute.xlu0 %689 }
 0x10a   :  { %958 = vmatmul.mubr.msk.bf16.vlgmr.msra.gmra.mxu0 %vm702_vm9, %v990_v7  ;;  %v685_v51 = vpop.permute.xlu1 %684 }
 0x10b   :  { %764 = vmatprep.mubr.bf16.mxu0 %v1064_v5 }
 0x10c   :  { %961 = vmatmul.mubr.msk.bf16.vlgmr.msra.gmra.mxu1 %vm702_vm9, %v990_v7 }
 0x10d   :  { %817 = vmatprep.mubr.bf16.mxu1 %v1064_v5 }
 0x112   :  { %959 = vmatmul.mubr.msk.bf16.gmra.mxu0 %vm702_vm9, %v991_v10 }
 0x114   :  { %962 = vmatmul.mubr.msk.bf16.gmra.mxu1 %vm702_vm9, %v991_v10 }
 0x1ca   :  { %v756_v55 = vpop.f32.mrf.mxu0 }
 0x1cb   :  { %v757_v34 = vadd.f32 %v756_v55, %v675_v36 }
 0x1cc   :  { %v809_v41 = vpop.f32.mrf.mxu1  ;;  %v758_v45 = vpop.f32.mrf.mxu0 }
 0x1cd   :  { %v810_v19 = vadd.f32 %v809_v41, %v675_v36  ;;  %v963_v12 = vmul.f32 -1.442695, %v757_v34  ;;  %v759_v46 = vadd.f32 %v758_v45, %v675_v36 }
 0x1ce   :  { %v811_v6 = vpop.f32.mrf.mxu1  ;;  %v760_v3 = vpop.f32.mrf.mxu0 }
 0x1cf   :  { %v965_v47 = vmul.f32 -1.442695, %v810_v19  ;;  %v812_v13 = vadd.f32 %v811_v6, %v675_v36  ;;  %992 = vpow2.f32 %v963_v12  ;;  %v964_v5 = vmul.f32 -1.442695, %v759_v46 }
 0x1d0   :  { %v761_v23 = vadd.f32 %v760_v3, %v680_v4  ;;  %v813_v24 = vpop.f32.mrf.mxu1  ;;  %v762_v40 = vpop.f32.mrf.mxu0  ;;  %v38_v3 = vld [vmem:[%s1714_s2] sm:$0xff] }
 0x1d1   :  { %994 = vpow2.f32 %v965_v47  ;;  %v966_v26 = vmul.f32 -1.442695, %v812_v13  ;;  %v814_v27 = vadd.f32 %v813_v24, %v680_v4  ;;  %v763_v25 = vadd.f32 %v762_v40, %v680_v4  ;;  %v40_v24 = vld [vmem:[%s1714_s2 + $0x10] sm:$0xff]  ;;  %v39_v40 = vld [vmem:[%s1714_s2 + $0x8] sm:$0xff] }
 0x1d2   :  { %996 = vpow2.f32 %v964_v5  ;;  %v967_v15 = vmul.f32 -1.442695, %v761_v23  ;;  %v815_v62 = vpop.f32.mrf.mxu1  ;;  %v766_v61 = vpop.f32.mrf.mxu0 }
 0x1d3   :  { %998 = vpow2.f32 %v966_v26  ;;  %v969_v52 = vmul.f32 -1.442695, %v814_v27  ;;  %v816_v50 = vadd.f32 %v815_v62, %v680_v4  ;;  %v968_v63 = vmul.f32 -1.442695, %v763_v25 }
 0x1d4   :  { %1000 = vpow2.f32 %v967_v15  ;;  %v767_v42 = vadd.f32 %v766_v61, %v685_v51  ;;  %v819_v43 = vpop.f32.mrf.mxu1  ;;  %v768_v30 = vpop.f32.mrf.mxu0 }
 0x1d5   :  { %1002 = vpow2.f32 %v969_v52  ;;  %v970_v32 = vmul.f32 -1.442695, %v816_v50  ;;  %v820_v60 = vadd.f32 %v819_v43, %v685_v51  ;;  %v769_v33 = vadd.f32 %v768_v30, %v685_v51  ;;  %v41_v52 = vld [vmem:[%s1714_s2 + $0x18] sm:$0xff] }
 0x1d6   :  { %1004 = vpow2.f32 %v968_v63  ;;  %v821_v57 = vpop.f32.mrf.mxu1  ;;  %v770_v9 = vpop.f32.mrf.mxu0 }
 0x1d7   :  { %1006 = vpow2.f32 %v970_v32  ;;  %v822_v48 = vadd.f32 %v821_v57, %v685_v51  ;;  %v771_v37 = vadd.f32 %v770_v9, %v690_v0 }
 0x1d8   :  { %1008 = vtanh.f32 %v767_v42  ;;  %v823_v49 = vpop.f32.mrf.mxu1  ;;  %v772_v56 = vpop.f32.mrf.mxu0 }
 0x1d9   :  { %1010 = vtanh.f32 %v820_v60  ;;  %v824_v54 = vadd.f32 %v823_v49, %v690_v0  ;;  %v971_v21 = vmul.f32 -1.442695, %v771_v37  ;;  %v773_v29 = vadd.f32 %v772_v56, %v690_v0 }
 0x1da   :  { %1012 = vtanh.f32 %v769_v33  ;;  %v825_v22 = vpop.f32.mrf.mxu1 }
 0x1db   :  { %1014 = vtanh.f32 %v822_v48  ;;  %v973_v59 = vmul.f32 -1.442695, %v824_v54  ;;  %v826_v58 = vadd.f32 %v825_v22, %v690_v0  ;;  %v972_v1 = vmul.f32 -1.442695, %v773_v29 }
 0x1dc   :  { %1016 = vpow2.f32 %v971_v21  ;;  %v993_v16 = vpop.eup %992 }
 0x1dd   :  { %1018 = vpow2.f32 %v973_v59  ;;  %v974_v14 = vmul.f32 -1.442695, %v826_v58  ;;  %v840_v18 = vadd.f32 1.0, %v993_v16 }
 0x1de   :  { %v995_v17 = vpop.eup %994  ;;  %1020 = vpow2.f32 %v972_v1 }
 0x1df   :  { %v997_v39 = vpop.eup %996  ;;  %v842_v11 = vadd.f32 1.0, %v995_v17  ;;  %1022 = vpow2.f32 %v974_v14 }
 0x1e0   :  { %v999_v44 = vpop.eup %998  ;;  %1024 = vrcp.f32 %v840_v18  ;;  %v841_v20 = vadd.f32 1.0, %v997_v39 }
 0x1e1   :  { %v1001_v8 = vpop.eup %1000  ;;  %1026 = vrcp.f32 %v842_v11  ;;  %v843_v28 = vadd.f32 1.0, %v999_v44 }
 0x1e2   :  { %v1003_v2 = vpop.eup %1002  ;;  %1028 = vrcp.f32 %v841_v20  ;;  %v864_v53 = vadd.f32 1.0, %v1001_v8 }
 0x1e3   :  { %v1005_v38 = vpop.eup %1004  ;;  %1030 = vrcp.f32 %v843_v28  ;;  %v866_v31 = vadd.f32 1.0, %v1003_v2 }
 0x1e4   :  { %v1007_v35 = vpop.eup %1006  ;;  %1032 = vrcp.f32 %v864_v53  ;;  %v865_v7 = vadd.f32 1.0, %v1005_v38 }
 0x1e5   :  { %v1009_v10 = vpop.eup %1008  ;;  %1034 = vrcp.f32 %v866_v31  ;;  %v867_v36 = vadd.f32 1.0, %v1007_v35 }
 0x1e6   :  { %v1011_v55 = vpop.eup %1010  ;;  %1036 = vrcp.f32 %v865_v7 }
 0x1e7   :  { %v1013_v4 = vpop.eup %1012  ;;  %1038 = vrcp.f32 %v867_v36 }
 0x1e8   :  { %v1015_v34 = vpop.eup %1014 }
 0x1e9   :  { %v1017_v41 = vpop.eup %1016 }
 0x1ea   :  { %v1019_v19 = vpop.eup %1018  ;;  %v892_v47 = vadd.f32 1.0, %v1017_v41 }
 0x1eb   :  { %v1021_v45 = vpop.eup %1020  ;;  %v894_v5 = vadd.f32 1.0, %v1019_v19 }
 0x1ec   :  { %v1023_v12 = vpop.eup %1022  ;;  %v893_v26 = vadd.f32 1.0, %v1021_v45  ;;  %1040 = vrcp.f32 %v892_v47 }
 0x1ed   :  { %v1025_v46 = vpop.eup %1024  ;;  %v895_v51 = vadd.f32 1.0, %v1023_v12  ;;  %1042 = vrcp.f32 %v894_v5 }
 0x1ee   :  { %v1027_v6 = vpop.eup %1026  ;;  %v912_v62 = vmul.f32 %v1025_v46, %v1009_v10  ;;  %1044 = vrcp.f32 %v893_v26 }
 0x1ef   :  { %v1029_v13 = vpop.eup %1028  ;;  %v914_v63 = vmul.f32 %v1027_v6, %v1011_v55  ;;  %1046 = vrcp.f32 %v895_v51 }
 0x1f0   :  { %v1031_v23 = vpop.eup %1030  ;;  %v913_v60 = vmul.f32 %v1029_v13, %v1013_v4 }
 0x1f1   :  { %v1033_v27 = vpop.eup %1032  ;;  %v915_v57 = vmul.f32 %v1031_v23, %v1015_v34 }
 0x1f2   :  { %v1035_v15 = vpop.eup %1034  ;;  %v908_v25 = vmul.f32 %v1033_v27, %v38_v3 }
 0x1f3   :  { %v1037_v50 = vpop.eup %1036  ;;  %v910_v61 = vmul.f32 %v1035_v15, %v40_v24 }
 0x1f4   :  { %v1039_v42 = vpop.eup %1038  ;;  %v916_v43 = vadd.f32 %v912_v62, %v908_v25  ;;  %v909_v32 = vmul.f32 %v1037_v50, %v39_v40 }
 0x1f5   :  { %v918_v30 = vadd.f32 %v914_v63, %v910_v61  ;;  %v911_v33 = vmul.f32 %v1039_v42, %v41_v52 }
 0x1f6   :  { %1048 = vtanh.f32 %v916_v43  ;;  %943 = vst [vmem:[%s1715_s7] sm:$0xff] %v916_v43  ;;  %v917_v0 = vadd.f32 %v913_v60, %v909_v32 }
 0x1f7   :  { %1050 = vtanh.f32 %v918_v30  ;;  %945 = vst [vmem:[%s1715_s7 + $0x10] sm:$0xff] %v918_v30  ;;  %v919_v48 = vadd.f32 %v915_v57, %v911_v33 }
 0x1f8   :  { %1052 = vtanh.f32 %v917_v0  ;;  %944 = vst [vmem:[%s1715_s7 + $0x8] sm:$0xff] %v917_v0 }
 0x1f9   :  { %1054 = vtanh.f32 %v919_v48  ;;  %946 = vst [vmem:[%s1715_s7 + $0x18] sm:$0xff] %v919_v48  ;;  %v1041_v9 = vpop.eup %1040 }
 0x1fa   :  { %v1043_v37 = vpop.eup %1042 }
 0x1fb   :  { %v1045_v49 = vpop.eup %1044 }
 0x1fc   :  { %v1047_v54 = vpop.eup %1046 }
 0x203   :  { %v1049_v56 = vpop.eup %1048 }
 0x204   :  { %v1051_v21 = vpop.eup %1050  ;;  %v924_v29 = vmul.f32 %v1049_v56, %v1041_v9 }
 0x205   :  { %v1053_v22 = vpop.eup %1052  ;;  %v926_v59 = vmul.f32 %v1051_v21, %v1043_v37 }
 0x206   :  { %v1055_v58 = vpop.eup %1054  ;;  %932 = vst [vmem:[#allocation2 + $0x10] sm:$0xff] %v924_v29  ;;  %936 = vst [vmem:[%s1716_s6] sm:$0xff] %v924_v29  ;;  %v925_v1 = vmul.f32 %v1053_v22, %v1045_v49 }
 0x207   :  { %934 = vst [vmem:[#allocation2 + $0x18] sm:$0xff] %v926_v59  ;;  %938 = vst [vmem:[%s1716_s6 + $0x10] sm:$0xff] %v926_v59  ;;  %v927_v16 = vmul.f32 %v1055_v58, %v1047_v54 }
 0x208   :  { %933 = vst [vmem:[#allocation2] sm:$0xff] %v925_v1  ;;  %937 = vst [vmem:[%s1716_s6 + $0x8] sm:$0xff] %v925_v1 }
 0x209   :  { %935 = vst [vmem:[#allocation2 + $0x8] sm:$0xff] %v927_v16  ;;  %939 = vst [vmem:[%s1716_s6 + $0x18] sm:$0xff] %v927_v16 }

</bundles_post_ra>
